<compile_context>
chip_gen: v6e
topology: v6e:2x2x1
jax: 0.10.0
libtpu: 0.0.40
codegen_flags: <defaults>
</compile_context>

<pallas_src>
import numpy as np
import jax
import jax.numpy as jnp
from jax import lax
from jax.experimental import pallas as pl
from jax.experimental.pallas import tpu as pltpu  # noqa: F401  (no TPU-specific API needed)

NEG_SLOPE = 0.01
BN_EPS = 1e-5


# ----------------------- one-time host-side preparation ----------------------

def prepare_up_params(params, x1_shape, x2_shape):
    """Build banded weight matrices, lane-tiled BN params, channel-group
    matrices and row-shift matrices.  Called once, outside the jitted forward."""
    N, Cin, H, W = x1_shape
    _, Cup, H2, W2 = x2_shape
    assert Cup == Cin // 2
    c1_w = np.asarray(params["c1_w"], np.float32)          # (Cout, 2*Cup, 3, 3)
    c2_w = np.asarray(params["c2_w"], np.float32)          # (Cout, Cout, 3, 3)
    Cout = c1_w.shape[0]
    py, px = (H2 - 2 * H) // 2, (W2 - 2 * W) // 2
    L1, Lu, Lc = N * W * Cin, N * W2 * Cup, N * W2 * Cout
    eyeN = np.eye(N, dtype=np.float32)

    # ConvTranspose2d(k=2, s=2) band, batch-block-diagonal, width pad px folded
    # into zero columns.  Column layout: n*W2*Cup + (px+j)*Cup + co.
    wt = np.asarray(params["up_w"], np.float32)             # (Cin, Cup, 2, 2)
    bands = []
    for ph in range(2):                                     # output-row parity (kh)
        B = np.zeros((W * Cin, W2 * Cup), np.float32)
        for ws in range(W):
            for pw in range(2):
                j = 2 * ws + pw
                B[ws * Cin:(ws + 1) * Cin,
                  (px + j) * Cup:(px + j + 1) * Cup] = wt[:, :, ph, pw]
        bands.append(np.kron(eyeN, B))
    w_up = np.concatenate(bands, axis=1)                    # (L1, 2*Lu)

    # 3x3 conv band per kernel row kh (width kw padding folded into the band):
    #   B[ws*Cb + cb, wo*Cout + co] = w[co, ci_lo+cb, kh, ws - wo + 1]
    def conv3_bands(w, ci_lo, ci_hi):
        Cb, Co = ci_hi - ci_lo, w.shape[0]
        mats = []
        for kh in range(3):
            B = np.zeros((W2 * Cb, W2 * Co), np.float32)
            for wo in range(W2):
                for kw in range(3):
                    ws = wo + kw - 1
                    if 0 <= ws < W2:
                        B[ws * Cb:(ws + 1) * Cb,
                          wo * Co:(wo + 1) * Co] = w[:, ci_lo:ci_hi, kh, kw].T
            mats.append(np.kron(eyeN, B))
        return mats

    a_b = conv3_bands(c1_w, 0, Cup)          # skip-connection (x2) half of concat
    b_b = conv3_bands(c1_w, Cup, 2 * Cup)    # up-sampled (x1) half of concat
    # K-order must match the in-kernel concat: [x2|u] per tap, taps kh=0,1,2.
    w1 = np.concatenate([a_b[0], b_b[0], a_b[1], b_b[1], a_b[2], b_b[2]], axis=0)
    w2 = np.concatenate(conv3_bands(c2_w, 0, Cout), axis=0)

    def lanes(v, C, L):                      # (C,) -> (1, L) with channel = lane % C
        return np.tile(np.asarray(v, np.float32), L // C).reshape(1, L)

    # ConvT bias only on the lanes the transpose-conv actually produces.
    b_up = np.zeros((1, Lu), np.float32)
    colmask = np.zeros((1, Lu), np.float32)
    up_b = np.asarray(params["up_b"], np.float32)
    for n in range(N):
        for j in range(2 * W):
            c0 = n * W2 * Cup + (px + j) * Cup
            b_up[0, c0:c0 + Cup] = up_b
            colmask[0, c0:c0 + Cup] = 1.0

    def group_mat(C, L):                     # channel-group sum + broadcast matrix
        S = np.tile(np.eye(C, dtype=np.float32), (L // C, 1))    # (L, C)
        return S @ S.T                                            # (L, L)

    # Exact 0/1 row-shift matrices for the 3x3 height taps.
    d_dn = np.eye(H2, k=-1, dtype=np.float32)   # (D @ x)[r] = x[r-1], row 0 = 0
    d_up = np.eye(H2, k=+1, dtype=np.float32)   # (D @ x)[r] = x[r+1], last row = 0

    bf16 = jnp.bfloat16
    prep = dict(
        w_up=jnp.asarray(w_up, bf16),
        w1=jnp.asarray(w1, bf16),
        w2=jnp.asarray(w2, bf16),
        b_up=jnp.asarray(b_up),
        b1=jnp.asarray(lanes(params["c1_b"], Cout, Lc)),
        b2=jnp.asarray(lanes(params["c2_b"], Cout, Lc)),
        g_up=jnp.asarray(lanes(params["up_gamma"], Cup, Lu)),
        be_up=jnp.asarray(lanes(params["up_beta"], Cup, Lu)),
        g1=jnp.asarray(lanes(params["bn1_gamma"], Cout, Lc)),
        be1=jnp.asarray(lanes(params["bn1_beta"], Cout, Lc)),
        g2=jnp.asarray(lanes(params["bn2_gamma"], Cout, Lc)),
        be2=jnp.asarray(lanes(params["bn2_beta"], Cout, Lc)),
        p_up=jnp.asarray(group_mat(Cup, Lu)),
        p_c=jnp.asarray(group_mat(Cout, Lc)),
        d_dn=jnp.asarray(d_dn, bf16),
        d_up=jnp.asarray(d_up, bf16),
    )
    if (2 * H != H2) or (2 * W != W2):       # F.pad region actually non-empty
        rowmask = np.zeros((H2, 1), np.float32)
        rowmask[py:py + 2 * H, 0] = 1.0
        prep["mask"] = jnp.asarray(rowmask * colmask)           # (H2, Lu)
    return prep


# ------------------------------- Up.forward ----------------------------------

@jax.jit
def up_forward(prep, x1_nchw, x2_nchw):
    N, Cin, H, W = x1_nchw.shape
    _, Cup, H2, W2 = x2_nchw.shape
    Lc = prep["w2"].shape[1]
    Cout = Lc // (N * W2)
    L1, Lu = N * W * Cin, N * W2 * Cup
    py = (H2 - 2 * H) // 2
    use_mask = "mask" in prep
    f32, bf16 = jnp.float32, jnp.bfloat16
    inv_cnt_up = 1.0 / float(N * 2 * H * 2 * W)      # valid conv-transpose pixels
    inv_cnt_c = 1.0 / float(N * H2 * W2)

    # Layout: rows = (padded) height, lanes = batch * width * channels.
    x1_rows = jnp.transpose(x1_nchw, (2, 0, 3, 1)).reshape(H, L1)
    x1_dup = jnp.repeat(x1_rows, 2, axis=0)                          # row r -> x1 row r//2
    x1_slab = jnp.pad(x1_dup, ((py, H2 - 2 * H - py), (0, 0))).astype(bf16)   # (H2, L1)
    x2_slab = jnp.transpose(x2_nchw, (2, 0, 3, 1)).reshape(H2, Lu).astype(bf16)

    def kernel(x1_ref, x2_ref, wup_ref, w1_ref, w2_ref,
               bup_ref, b1_ref, b2_ref, gup_ref, beup_ref,
               g1_ref, be1_ref, g2_ref, be2_ref, pup_ref, pc_ref,
               ddn_ref, dup_ref, *rest):
        if use_mask:
            mask_ref, o_ref = rest
        else:
            (o_ref,) = rest

        def bn_lrelu(v, g, b, p_ref, inv_cnt):
            # Training-mode BatchNorm (batch mean / biased var) + LeakyReLU, f32.
            row_s = jnp.sum(v, axis=0, keepdims=True)
            row_q = jnp.sum(v * v, axis=0, keepdims=True)
            mean = jnp.dot(row_s, p_ref[...], preferred_element_type=f32) * inv_cnt
            ex2 = jnp.dot(row_q, p_ref[...], preferred_element_type=f32) * inv_cnt
            var = jnp.maximum(ex2 - mean * mean, 0.0)     # cancellation guard
            scale = g * lax.rsqrt(var + BN_EPS)
            shift = b - mean * scale
            y = v * scale + shift
            return jnp.where(y >= 0, y, NEG_SLOPE * y)

        def shift3(xb):
            # Height taps r-1 / r / r+1 via exact 0/1 shift matmuls (MXU),
            # avoiding sublane-misaligned reads entirely.
            x_dn = jnp.dot(ddn_ref[...], xb, preferred_element_type=f32).astype(bf16)
            x_up = jnp.dot(dup_ref[...], xb, preferred_element_type=f32).astype(bf16)
            return x_dn, xb, x_up

        # ---- ConvTranspose2d(k=2, s=2) + BN + LeakyReLU ----
        ub = jnp.dot(x1_ref[...], wup_ref[...], preferred_element_type=f32)  # (H2, 2*Lu)
        rows = lax.broadcasted_iota(jnp.int32, (H2, 1), 0)
        even = (rows & 1) == (py & 1)                  # output-row parity of up(x1)
        u = jnp.where(even, ub[:, :Lu], ub[:, Lu:]) + bup_ref[...]
        if use_mask:
            u = u * mask_ref[...]                      # keep F.pad region out of stats
        u = bn_lrelu(u, gup_ref[...], beup_ref[...], pup_ref, inv_cnt_up)
        if use_mask:
            u = u * mask_ref[...]                      # F.pad zeros feed conv1

        # ---- conv1 on concat([x2, up(x1)]): 3 height taps folded into K ----
        x12 = jnp.concatenate([x2_ref[...], u.astype(bf16)], axis=1)     # (H2, 2*Lu)
        xcat = jnp.concatenate(shift3(x12), axis=1)                      # (H2, 6*Lu)
        a1 = jnp.dot(xcat, w1_ref[...], preferred_element_type=f32) + b1_ref[...]
        y1 = bn_lrelu(a1, g1_ref[...], be1_ref[...], pc_ref, inv_cnt_c)

        # ---- conv2 ----
        ycat = jnp.concatenate(shift3(y1.astype(bf16)), axis=1)          # (H2, 3*Lc)
        a2 = jnp.dot(ycat, w2_ref[...], preferred_element_type=f32) + b2_ref[...]
        o_ref[...] = bn_lrelu(a2, g2_ref[...], be2_ref[...], pc_ref, inv_cnt_c)

    operands = [x1_slab, x2_slab, prep["w_up"], prep["w1"], prep["w2"],
                prep["b_up"], prep["b1"], prep["b2"], prep["g_up"], prep["be_up"],
                prep["g1"], prep["be1"], prep["g2"], prep["be2"],
                prep["p_up"], prep["p_c"], prep["d_dn"], prep["d_up"]]
    if use_mask:
        operands.append(prep["mask"])

    flops = (2 * H2 * (L1 * 2 * Lu + 6 * Lu * Lc + 3 * Lc * Lc)      # main matmuls
             + 4 * 2 * H2 * H2 * (2 * Lu + Lc)                       # shift matmuls
             + 40 * H2 * (Lu + 2 * Lc))                              # BN / LReLU VPU work
    bytes_accessed = sum(int(a.size) * a.dtype.itemsize for a in operands) + H2 * Lc * 4
    cost = pl.CostEstimate(flops=int(flops), transcendentals=int(Lu + 2 * Lc),
                           bytes_accessed=int(bytes_accessed))

    out = pl.pallas_call(
        kernel,
        out_shape=jax.ShapeDtypeStruct((H2, Lc), f32),   # lane-dense (16, 128) slab
        cost_estimate=cost,
    )(*operands)

    y = out.reshape(H2, N, W2, Cout)
    return jnp.transpose(y, (1, 3, 0, 2))                # back to NCHW


# ----------------------------- pure-JAX reference -----------------------------

def _leaky(x):
    return jnp.where(x >= 0, x, NEG_SLOPE * x)


def _bn_ref(x_nchw, gamma, beta):
    mean = jnp.mean(x_nchw, axis=(0, 2, 3), keepdims=True)
    var = jnp.mean((x_nchw - mean) ** 2, axis=(0, 2, 3), keepdims=True)
    return ((x_nchw - mean) / jnp.sqrt(var + BN_EPS)
            * gamma[None, :, None, None] + beta[None, :, None, None])


def up_ref(params, x1, x2):
    wt = params["up_w"]                                  # (Cin, Cup, 2, 2)
    N, Cin, H, W = x1.shape
    Cup = wt.shape[1]
    t = jnp.einsum("nchw,cokl->nhwklo", x1, wt, precision=lax.Precision.HIGHEST)
    t = t.transpose(0, 5, 1, 3, 2, 4).reshape(N, Cup, 2 * H, 2 * W)
    t = t + params["up_b"][None, :, None, None]
    t = _leaky(_bn_ref(t, params["up_gamma"], params["up_beta"]))
    diffY = x2.shape[2] - t.shape[2]
    diffX = x2.shape[3] - t.shape[3]
    t = jnp.pad(t, ((0, 0), (0, 0),
                    (diffY // 2, diffY - diffY // 2),
                    (diffX // 2, diffX - diffX // 2)))
    x = jnp.concatenate([x2, t], axis=1)

    def conv3(x, w, b):
        return lax.conv_general_dilated(
            x, w, (1, 1), ((1, 1), (1, 1)),
            dimension_numbers=("NCHW", "OIHW", "NCHW"),
            precision=lax.Precision.HIGHEST) + b[None, :, None, None]

    y = _leaky(_bn_ref(conv3(x, params["c1_w"], params["c1_b"]),
                       params["bn1_gamma"], params["bn1_beta"]))
    y = _leaky(_bn_ref(conv3(y, params["c2_w"], params["c2_b"]),
                       params["bn2_gamma"], params["bn2_beta"]))
    return y


# ---------------------------------- main --------------------------------------

def _make_params(key, in_ch, out_ch):
    ks = jax.random.split(key, 12)
    return {
        "up_w":      0.1 * jax.random.normal(ks[0], (in_ch, in_ch // 2, 2, 2), jnp.float32),
        "up_b":      0.1 * jax.random.normal(ks[1], (in_ch // 2,), jnp.float32),
        "up_gamma":  1.0 + 0.1 * jax.random.normal(ks[2], (in_ch // 2,), jnp.float32),
        "up_beta":   0.1 * jax.random.normal(ks[3], (in_ch // 2,), jnp.float32),
        "c1_w":      0.1 * jax.random.normal(ks[4], (out_ch, in_ch, 3, 3), jnp.float32),
        "c1_b":      0.1 * jax.random.normal(ks[5], (out_ch,), jnp.float32),
        "bn1_gamma": 1.0 + 0.1 * jax.random.normal(ks[6], (out_ch,), jnp.float32),
        "bn1_beta":  0.1 * jax.random.normal(ks[7], (out_ch,), jnp.float32),
        "c2_w":      0.1 * jax.random.normal(ks[8], (out_ch, out_ch, 3, 3), jnp.float32),
        "c2_b":      0.1 * jax.random.normal(ks[9], (out_ch,), jnp.float32),
        "bn2_gamma": 1.0 + 0.1 * jax.random.normal(ks[10], (out_ch,), jnp.float32),
        "bn2_beta":  0.1 * jax.random.normal(ks[11], (out_ch,), jnp.float32),
    }


def _run_case(key, N, in_ch, out_ch, H, W, H2, W2):
    kp, k1, k2 = jax.random.split(key, 3)
    params = _make_params(kp, in_ch, out_ch)
    x1 = jax.random.normal(k1, (N, in_ch, H, W), jnp.float32)          # decoder feature
    x2 = jax.random.normal(k2, (N, in_ch // 2, H2, W2), jnp.float32)   # skip connection

    prep = prepare_up_params(params, x1.shape, x2.shape)   # one-time, outside jit
    out = jax.block_until_ready(up_forward(prep, x1, x2))
    ref = jax.block_until_ready(up_ref(params, x1, x2))

    assert out.shape == (N, out_ch, H2, W2), out.shape
    assert bool(jnp.all(jnp.isfinite(out)))
    err = float(jnp.max(jnp.abs(out - ref)))
    # bf16 MXU operands (f32 accumulation) vs f32 reference -> loose tolerance.
    assert bool(jnp.allclose(out, ref, atol=2e-2, rtol=2e-2)), err
    return err


if __name__ == "__main__":
    # Main case: diffY = diffX = 0 (up-sampled x1 matches x2 spatially).
    _run_case(jax.random.PRNGKey(0), N=2, in_ch=8, out_ch=4, H=8, W=8, H2=16, W2=16)
    # Odd decoder size: exercises the F.pad path (diffY = diffX = 2).
    _run_case(jax.random.PRNGKey(1), N=2, in_ch=8, out_ch=4, H=7, W=7, H2=16, W2=16)
    print("KERNEL_OK")
</pallas_src>

<mosaic_0001>
module attributes {stable_mosaic.version = 11 : i64} {
  func.func @kernel(%arg0: memref<16x128xbf16, #tpu.memory_space<vmem>>, %arg1: memref<16x128xbf16, #tpu.memory_space<vmem>>, %arg2: memref<128x256xbf16, #tpu.memory_space<vmem>>, %arg3: memref<768x128xbf16, #tpu.memory_space<vmem>>, %arg4: memref<384x128xbf16, #tpu.memory_space<vmem>>, %arg5: memref<1x128xf32, #tpu.memory_space<vmem>>, %arg6: memref<1x128xf32, #tpu.memory_space<vmem>>, %arg7: memref<1x128xf32, #tpu.memory_space<vmem>>, %arg8: memref<1x128xf32, #tpu.memory_space<vmem>>, %arg9: memref<1x128xf32, #tpu.memory_space<vmem>>, %arg10: memref<1x128xf32, #tpu.memory_space<vmem>>, %arg11: memref<1x128xf32, #tpu.memory_space<vmem>>, %arg12: memref<1x128xf32, #tpu.memory_space<vmem>>, %arg13: memref<1x128xf32, #tpu.memory_space<vmem>>, %arg14: memref<128x128xf32, #tpu.memory_space<vmem>>, %arg15: memref<128x128xf32, #tpu.memory_space<vmem>>, %arg16: memref<16x16xbf16, #tpu.memory_space<vmem>>, %arg17: memref<16x16xbf16, #tpu.memory_space<vmem>>, %arg18: memref<16x128xf32, #tpu.memory_space<vmem>>) attributes {dimension_semantics = [], scalar_prefetch = 0 : i64, scratch_operands = 0 : i64, tpu.core_type = #tpu.core_type<tc>} {
    %c0 = arith.constant 0 : index
    %c0_0 = arith.constant 0 : index
    %0 = vector.load %arg0[%c0, %c0_0] : memref<16x128xbf16, #tpu.memory_space<vmem>>, vector<16x128xbf16>
    %c0_1 = arith.constant 0 : index
    %c0_2 = arith.constant 0 : index
    %1 = vector.load %arg2[%c0_1, %c0_2] : memref<128x256xbf16, #tpu.memory_space<vmem>>, vector<128x256xbf16>
    %cst = arith.constant dense<0.000000e+00> : vector<16x256xf32>
    %2 = tpu.matmul %0, %1, %cst {dimension_numbers = #tpu.dot_dimension_numbers<[1], [0], [0], [1], [0, 0, 1, 1], [], []>} : vector<16x128xbf16>, vector<128x256xbf16>, vector<16x256xf32> -> vector<16x256xf32>
    %3 = tpu.iota {dimensions = array<i32: 0>} : vector<16x1xi32>
    %c1_i32 = arith.constant 1 : i32
    %4 = vector.broadcast %c1_i32 : i32 to vector<16x1xi32>
    %5 = arith.andi %3, %4 : vector<16x1xi32>
    %c0_i32 = arith.constant 0 : i32
    %6 = vector.broadcast %c0_i32 : i32 to vector<16x1xi32>
    %7 = arith.cmpi eq, %5, %6 : vector<16x1xi32>
    %8 = vector.extract_strided_slice %2 {offsets = [0, 0], sizes = [16, 128], strides = [1, 1]} : vector<16x256xf32> to vector<16x128xf32>
    %9 = vector.extract_strided_slice %2 {offsets = [0, 128], sizes = [16, 128], strides = [1, 1]} : vector<16x256xf32> to vector<16x128xf32>
    %10 = vector.shape_cast %7 : vector<16x1xi1> to vector<16x1xi1>
    %11 = vector.broadcast %10 : vector<16x1xi1> to vector<16x128xi1>
    %12 = arith.select %11, %8, %9 : vector<16x128xi1>, vector<16x128xf32>
    %c0_3 = arith.constant 0 : index
    %c0_4 = arith.constant 0 : index
    %13 = vector.load %arg5[%c0_3, %c0_4] : memref<1x128xf32, #tpu.memory_space<vmem>>, vector<1x128xf32>
    %14 = vector.broadcast %13 : vector<1x128xf32> to vector<16x128xf32>
    %15 = arith.addf %12, %14 : vector<16x128xf32>
    %c0_5 = arith.constant 0 : index
    %c0_6 = arith.constant 0 : index
    %16 = vector.load %arg8[%c0_5, %c0_6] : memref<1x128xf32, #tpu.memory_space<vmem>>, vector<1x128xf32>
    %c0_7 = arith.constant 0 : index
    %c0_8 = arith.constant 0 : index
    %17 = vector.load %arg9[%c0_7, %c0_8] : memref<1x128xf32, #tpu.memory_space<vmem>>, vector<1x128xf32>
    %cst_9 = arith.constant dense<0.000000e+00> : vector<128xf32>
    %18 = vector.multi_reduction <add>, %15, %cst_9 [0] : vector<16x128xf32> to vector<128xf32>
    %19 = vector.shape_cast %18 : vector<128xf32> to vector<1x128xf32>
    %20 = arith.mulf %15, %15 : vector<16x128xf32>
    %cst_10 = arith.constant dense<0.000000e+00> : vector<128xf32>
    %21 = vector.multi_reduction <add>, %20, %cst_10 [0] : vector<16x128xf32> to vector<128xf32>
    %22 = vector.shape_cast %21 : vector<128xf32> to vector<1x128xf32>
    %c0_11 = arith.constant 0 : index
    %c0_12 = arith.constant 0 : index
    %23 = vector.load %arg14[%c0_11, %c0_12] : memref<128x128xf32, #tpu.memory_space<vmem>>, vector<128x128xf32>
    %cst_13 = arith.constant dense<0.000000e+00> : vector<1x128xf32>
    %24 = tpu.matmul %19, %23, %cst_13 {dimension_numbers = #tpu.dot_dimension_numbers<[1], [0], [0], [1], [0, 0, 1, 1], [], []>} : vector<1x128xf32>, vector<128x128xf32>, vector<1x128xf32> -> vector<1x128xf32>
    %cst_14 = arith.constant 0.001953125 : f32
    %25 = vector.broadcast %cst_14 : f32 to vector<1x128xf32>
    %26 = arith.mulf %24, %25 : vector<1x128xf32>
    %c0_15 = arith.constant 0 : index
    %c0_16 = arith.constant 0 : index
    %27 = vector.load %arg14[%c0_15, %c0_16] : memref<128x128xf32, #tpu.memory_space<vmem>>, vector<128x128xf32>
    %cst_17 = arith.constant dense<0.000000e+00> : vector<1x128xf32>
    %28 = tpu.matmul %22, %27, %cst_17 {dimension_numbers = #tpu.dot_dimension_numbers<[1], [0], [0], [1], [0, 0, 1, 1], [], []>} : vector<1x128xf32>, vector<128x128xf32>, vector<1x128xf32> -> vector<1x128xf32>
    %cst_18 = arith.constant 0.001953125 : f32
    %29 = vector.broadcast %cst_18 : f32 to vector<1x128xf32>
    %30 = arith.mulf %28, %29 : vector<1x128xf32>
    %31 = arith.mulf %26, %26 : vector<1x128xf32>
    %32 = arith.subf %30, %31 : vector<1x128xf32>
    %cst_19 = arith.constant 0.000000e+00 : f32
    %33 = vector.broadcast %cst_19 : f32 to vector<1x128xf32>
    %34 = arith.maximumf %32, %33 : vector<1x128xf32>
    %cst_20 = arith.constant 9.99999974E-6 : f32
    %35 = vector.broadcast %cst_20 : f32 to vector<1x128xf32>
    %36 = arith.addf %34, %35 : vector<1x128xf32>
    %37 = math.rsqrt %36 : vector<1x128xf32>
    %38 = arith.mulf %16, %37 : vector<1x128xf32>
    %39 = arith.mulf %26, %38 : vector<1x128xf32>
    %40 = arith.subf %17, %39 : vector<1x128xf32>
    %41 = vector.broadcast %38 : vector<1x128xf32> to vector<16x128xf32>
    %42 = arith.mulf %15, %41 : vector<16x128xf32>
    %43 = vector.broadcast %40 : vector<1x128xf32> to vector<16x128xf32>
    %44 = arith.addf %42, %43 : vector<16x128xf32>
    %cst_21 = arith.constant 0.000000e+00 : f32
    %45 = vector.broadcast %cst_21 : f32 to vector<16x128xf32>
    %46 = arith.cmpf oge, %44, %45 : vector<16x128xf32>
    %cst_22 = arith.constant 0.00999999977 : f32
    %47 = vector.broadcast %cst_22 : f32 to vector<16x128xf32>
    %48 = arith.mulf %47, %44 : vector<16x128xf32>
    %49 = arith.select %46, %44, %48 : vector<16x128xi1>, vector<16x128xf32>
    %c0_23 = arith.constant 0 : index
    %c0_24 = arith.constant 0 : index
    %50 = vector.load %arg1[%c0_23, %c0_24] : memref<16x128xbf16, #tpu.memory_space<vmem>>, vector<16x128xbf16>
    %51 = arith.truncf %49 : vector<16x128xf32> to vector<16x128xbf16>
    %52 = tpu.concatenate %50, %51 in 1 : vector<16x128xbf16>, vector<16x128xbf16> -> vector<16x256xbf16>
    %c0_25 = arith.constant 0 : index
    %c0_26 = arith.constant 0 : index
    %53 = vector.load %arg16[%c0_25, %c0_26] : memref<16x16xbf16, #tpu.memory_space<vmem>>, vector<16x16xbf16>
    %cst_27 = arith.constant dense<0.000000e+00> : vector<16x256xf32>
    %54 = tpu.matmul %53, %52, %cst_27 {dimension_numbers = #tpu.dot_dimension_numbers<[1], [0], [0], [1], [0, 0, 1, 1], [], []>} : vector<16x16xbf16>, vector<16x256xbf16>, vector<16x256xf32> -> vector<16x256xf32>
    %55 = arith.truncf %54 : vector<16x256xf32> to vector<16x256xbf16>
    %c0_28 = arith.constant 0 : index
    %c0_29 = arith.constant 0 : index
    %56 = vector.load %arg17[%c0_28, %c0_29] : memref<16x16xbf16, #tpu.memory_space<vmem>>, vector<16x16xbf16>
    %cst_30 = arith.constant dense<0.000000e+00> : vector<16x256xf32>
    %57 = tpu.matmul %56, %52, %cst_30 {dimension_numbers = #tpu.dot_dimension_numbers<[1], [0], [0], [1], [0, 0, 1, 1], [], []>} : vector<16x16xbf16>, vector<16x256xbf16>, vector<16x256xf32> -> vector<16x256xf32>
    %58 = arith.truncf %57 : vector<16x256xf32> to vector<16x256xbf16>
    %59 = tpu.concatenate %55, %52, %58 in 1 : vector<16x256xbf16>, vector<16x256xbf16>, vector<16x256xbf16> -> vector<16x768xbf16>
    %c0_31 = arith.constant 0 : index
    %c0_32 = arith.constant 0 : index
    %60 = vector.load %arg3[%c0_31, %c0_32] : memref<768x128xbf16, #tpu.memory_space<vmem>>, vector<768x128xbf16>
    %cst_33 = arith.constant dense<0.000000e+00> : vector<16x128xf32>
    %61 = tpu.matmul %59, %60, %cst_33 {dimension_numbers = #tpu.dot_dimension_numbers<[1], [0], [0], [1], [0, 0, 1, 1], [], []>} : vector<16x768xbf16>, vector<768x128xbf16>, vector<16x128xf32> -> vector<16x128xf32>
    %c0_34 = arith.constant 0 : index
    %c0_35 = arith.constant 0 : index
    %62 = vector.load %arg6[%c0_34, %c0_35] : memref<1x128xf32, #tpu.memory_space<vmem>>, vector<1x128xf32>
    %63 = vector.broadcast %62 : vector<1x128xf32> to vector<16x128xf32>
    %64 = arith.addf %61, %63 : vector<16x128xf32>
    %c0_36 = arith.constant 0 : index
    %c0_37 = arith.constant 0 : index
    %65 = vector.load %arg10[%c0_36, %c0_37] : memref<1x128xf32, #tpu.memory_space<vmem>>, vector<1x128xf32>
    %c0_38 = arith.constant 0 : index
    %c0_39 = arith.constant 0 : index
    %66 = vector.load %arg11[%c0_38, %c0_39] : memref<1x128xf32, #tpu.memory_space<vmem>>, vector<1x128xf32>
    %cst_40 = arith.constant dense<0.000000e+00> : vector<128xf32>
    %67 = vector.multi_reduction <add>, %64, %cst_40 [0] : vector<16x128xf32> to vector<128xf32>
    %68 = vector.shape_cast %67 : vector<128xf32> to vector<1x128xf32>
    %69 = arith.mulf %64, %64 : vector<16x128xf32>
    %cst_41 = arith.constant dense<0.000000e+00> : vector<128xf32>
    %70 = vector.multi_reduction <add>, %69, %cst_41 [0] : vector<16x128xf32> to vector<128xf32>
    %71 = vector.shape_cast %70 : vector<128xf32> to vector<1x128xf32>
    %c0_42 = arith.constant 0 : index
    %c0_43 = arith.constant 0 : index
    %72 = vector.load %arg15[%c0_42, %c0_43] : memref<128x128xf32, #tpu.memory_space<vmem>>, vector<128x128xf32>
    %cst_44 = arith.constant dense<0.000000e+00> : vector<1x128xf32>
    %73 = tpu.matmul %68, %72, %cst_44 {dimension_numbers = #tpu.dot_dimension_numbers<[1], [0], [0], [1], [0, 0, 1, 1], [], []>} : vector<1x128xf32>, vector<128x128xf32>, vector<1x128xf32> -> vector<1x128xf32>
    %cst_45 = arith.constant 0.001953125 : f32
    %74 = vector.broadcast %cst_45 : f32 to vector<1x128xf32>
    %75 = arith.mulf %73, %74 : vector<1x128xf32>
    %c0_46 = arith.constant 0 : index
    %c0_47 = arith.constant 0 : index
    %76 = vector.load %arg15[%c0_46, %c0_47] : memref<128x128xf32, #tpu.memory_space<vmem>>, vector<128x128xf32>
    %cst_48 = arith.constant dense<0.000000e+00> : vector<1x128xf32>
    %77 = tpu.matmul %71, %76, %cst_48 {dimension_numbers = #tpu.dot_dimension_numbers<[1], [0], [0], [1], [0, 0, 1, 1], [], []>} : vector<1x128xf32>, vector<128x128xf32>, vector<1x128xf32> -> vector<1x128xf32>
    %cst_49 = arith.constant 0.001953125 : f32
    %78 = vector.broadcast %cst_49 : f32 to vector<1x128xf32>
    %79 = arith.mulf %77, %78 : vector<1x128xf32>
    %80 = arith.mulf %75, %75 : vector<1x128xf32>
    %81 = arith.subf %79, %80 : vector<1x128xf32>
    %cst_50 = arith.constant 0.000000e+00 : f32
    %82 = vector.broadcast %cst_50 : f32 to vector<1x128xf32>
    %83 = arith.maximumf %81, %82 : vector<1x128xf32>
    %cst_51 = arith.constant 9.99999974E-6 : f32
    %84 = vector.broadcast %cst_51 : f32 to vector<1x128xf32>
    %85 = arith.addf %83, %84 : vector<1x128xf32>
    %86 = math.rsqrt %85 : vector<1x128xf32>
    %87 = arith.mulf %65, %86 : vector<1x128xf32>
    %88 = arith.mulf %75, %87 : vector<1x128xf32>
    %89 = arith.subf %66, %88 : vector<1x128xf32>
    %90 = vector.broadcast %87 : vector<1x128xf32> to vector<16x128xf32>
    %91 = arith.mulf %64, %90 : vector<16x128xf32>
    %92 = vector.broadcast %89 : vector<1x128xf32> to vector<16x128xf32>
    %93 = arith.addf %91, %92 : vector<16x128xf32>
    %cst_52 = arith.constant 0.000000e+00 : f32
    %94 = vector.broadcast %cst_52 : f32 to vector<16x128xf32>
    %95 = arith.cmpf oge, %93, %94 : vector<16x128xf32>
    %cst_53 = arith.constant 0.00999999977 : f32
    %96 = vector.broadcast %cst_53 : f32 to vector<16x128xf32>
    %97 = arith.mulf %96, %93 : vector<16x128xf32>
    %98 = arith.select %95, %93, %97 : vector<16x128xi1>, vector<16x128xf32>
    %99 = arith.truncf %98 : vector<16x128xf32> to vector<16x128xbf16>
    %c0_54 = arith.constant 0 : index
    %c0_55 = arith.constant 0 : index
    %100 = vector.load %arg16[%c0_54, %c0_55] : memref<16x16xbf16, #tpu.memory_space<vmem>>, vector<16x16xbf16>
    %cst_56 = arith.constant dense<0.000000e+00> : vector<16x128xf32>
    %101 = tpu.matmul %100, %99, %cst_56 {dimension_numbers = #tpu.dot_dimension_numbers<[1], [0], [0], [1], [0, 0, 1, 1], [], []>} : vector<16x16xbf16>, vector<16x128xbf16>, vector<16x128xf32> -> vector<16x128xf32>
    %102 = arith.truncf %101 : vector<16x128xf32> to vector<16x128xbf16>
    %c0_57 = arith.constant 0 : index
    %c0_58 = arith.constant 0 : index
    %103 = vector.load %arg17[%c0_57, %c0_58] : memref<16x16xbf16, #tpu.memory_space<vmem>>, vector<16x16xbf16>
    %cst_59 = arith.constant dense<0.000000e+00> : vector<16x128xf32>
    %104 = tpu.matmul %103, %99, %cst_59 {dimension_numbers = #tpu.dot_dimension_numbers<[1], [0], [0], [1], [0, 0, 1, 1], [], []>} : vector<16x16xbf16>, vector<16x128xbf16>, vector<16x128xf32> -> vector<16x128xf32>
    %105 = arith.truncf %104 : vector<16x128xf32> to vector<16x128xbf16>
    %106 = tpu.concatenate %102, %99, %105 in 1 : vector<16x128xbf16>, vector<16x128xbf16>, vector<16x128xbf16> -> vector<16x384xbf16>
    %c0_60 = arith.constant 0 : index
    %c0_61 = arith.constant 0 : index
    %107 = vector.load %arg4[%c0_60, %c0_61] : memref<384x128xbf16, #tpu.memory_space<vmem>>, vector<384x128xbf16>
    %cst_62 = arith.constant dense<0.000000e+00> : vector<16x128xf32>
    %108 = tpu.matmul %106, %107, %cst_62 {dimension_numbers = #tpu.dot_dimension_numbers<[1], [0], [0], [1], [0, 0, 1, 1], [], []>} : vector<16x384xbf16>, vector<384x128xbf16>, vector<16x128xf32> -> vector<16x128xf32>
    %c0_63 = arith.constant 0 : index
    %c0_64 = arith.constant 0 : index
    %109 = vector.load %arg7[%c0_63, %c0_64] : memref<1x128xf32, #tpu.memory_space<vmem>>, vector<1x128xf32>
    %110 = vector.broadcast %109 : vector<1x128xf32> to vector<16x128xf32>
    %111 = arith.addf %108, %110 : vector<16x128xf32>
    %c0_65 = arith.constant 0 : index
    %c0_66 = arith.constant 0 : index
    %112 = vector.load %arg12[%c0_65, %c0_66] : memref<1x128xf32, #tpu.memory_space<vmem>>, vector<1x128xf32>
    %c0_67 = arith.constant 0 : index
    %c0_68 = arith.constant 0 : index
    %113 = vector.load %arg13[%c0_67, %c0_68] : memref<1x128xf32, #tpu.memory_space<vmem>>, vector<1x128xf32>
    %cst_69 = arith.constant dense<0.000000e+00> : vector<128xf32>
    %114 = vector.multi_reduction <add>, %111, %cst_69 [0] : vector<16x128xf32> to vector<128xf32>
    %115 = vector.shape_cast %114 : vector<128xf32> to vector<1x128xf32>
    %116 = arith.mulf %111, %111 : vector<16x128xf32>
    %cst_70 = arith.constant dense<0.000000e+00> : vector<128xf32>
    %117 = vector.multi_reduction <add>, %116, %cst_70 [0] : vector<16x128xf32> to vector<128xf32>
    %118 = vector.shape_cast %117 : vector<128xf32> to vector<1x128xf32>
    %c0_71 = arith.constant 0 : index
    %c0_72 = arith.constant 0 : index
    %119 = vector.load %arg15[%c0_71, %c0_72] : memref<128x128xf32, #tpu.memory_space<vmem>>, vector<128x128xf32>
    %cst_73 = arith.constant dense<0.000000e+00> : vector<1x128xf32>
    %120 = tpu.matmul %115, %119, %cst_73 {dimension_numbers = #tpu.dot_dimension_numbers<[1], [0], [0], [1], [0, 0, 1, 1], [], []>} : vector<1x128xf32>, vector<128x128xf32>, vector<1x128xf32> -> vector<1x128xf32>
    %cst_74 = arith.constant 0.001953125 : f32
    %121 = vector.broadcast %cst_74 : f32 to vector<1x128xf32>
    %122 = arith.mulf %120, %121 : vector<1x128xf32>
    %c0_75 = arith.constant 0 : index
    %c0_76 = arith.constant 0 : index
    %123 = vector.load %arg15[%c0_75, %c0_76] : memref<128x128xf32, #tpu.memory_space<vmem>>, vector<128x128xf32>
    %cst_77 = arith.constant dense<0.000000e+00> : vector<1x128xf32>
    %124 = tpu.matmul %118, %123, %cst_77 {dimension_numbers = #tpu.dot_dimension_numbers<[1], [0], [0], [1], [0, 0, 1, 1], [], []>} : vector<1x128xf32>, vector<128x128xf32>, vector<1x128xf32> -> vector<1x128xf32>
    %cst_78 = arith.constant 0.001953125 : f32
    %125 = vector.broadcast %cst_78 : f32 to vector<1x128xf32>
    %126 = arith.mulf %124, %125 : vector<1x128xf32>
    %127 = arith.mulf %122, %122 : vector<1x128xf32>
    %128 = arith.subf %126, %127 : vector<1x128xf32>
    %cst_79 = arith.constant 0.000000e+00 : f32
    %129 = vector.broadcast %cst_79 : f32 to vector<1x128xf32>
    %130 = arith.maximumf %128, %129 : vector<1x128xf32>
    %cst_80 = arith.constant 9.99999974E-6 : f32
    %131 = vector.broadcast %cst_80 : f32 to vector<1x128xf32>
    %132 = arith.addf %130, %131 : vector<1x128xf32>
    %133 = math.rsqrt %132 : vector<1x128xf32>
    %134 = arith.mulf %112, %133 : vector<1x128xf32>
    %135 = arith.mulf %122, %134 : vector<1x128xf32>
    %136 = arith.subf %113, %135 : vector<1x128xf32>
    %137 = vector.broadcast %134 : vector<1x128xf32> to vector<16x128xf32>
    %138 = arith.mulf %111, %137 : vector<16x128xf32>
    %139 = vector.broadcast %136 : vector<1x128xf32> to vector<16x128xf32>
    %140 = arith.addf %138, %139 : vector<16x128xf32>
    %cst_81 = arith.constant 0.000000e+00 : f32
    %141 = vector.broadcast %cst_81 : f32 to vector<16x128xf32>
    %142 = arith.cmpf oge, %140, %141 : vector<16x128xf32>
    %cst_82 = arith.constant 0.00999999977 : f32
    %143 = vector.broadcast %cst_82 : f32 to vector<16x128xf32>
    %144 = arith.mulf %143, %140 : vector<16x128xf32>
    %145 = arith.select %142, %140, %144 : vector<16x128xi1>, vector<16x128xf32>
    %c0_83 = arith.constant 0 : index
    %c0_84 = arith.constant 0 : index
    %146 = vector.load %arg18[%c0_83, %c0_84] : memref<16x128xf32, #tpu.memory_space<vmem>>, vector<16x128xf32>
    tpu.vector_store %arg18[%c0_83, %c0_84], %145 {strides = array<i32>} : memref<16x128xf32, #tpu.memory_space<vmem>>, vector<16x128xf32>,
    return
  }
}

</mosaic_0001>

<bundles_post_ra>
// kernel: up_forward.1
= control target key start
LH: loop header
LB: loop body
LE: loop exit
PB: predicated region body
PF: predicated region fallthrough
CT: control target
= control target key end

     0   :  { %s3233_s0 = inlined_call_operand.vmem [shape: bf16[16,128], index: 0, kind: input, shape index: {}]   ;;  %s3234_s1 = inlined_call_operand.vmem [shape: bf16[16,128], index: 1, kind: input, shape index: {}]   ;;  %s3235_s2 = inlined_call_operand.vmem [shape: bf16[128,256], index: 2, kind: input, shape index: {}]   ;;  %s3236_s3 = inlined_call_operand.vmem [shape: bf16[768,128], index: 3, kind: input, shape index: {}]   ;;  %s3237_s4 = inlined_call_operand.vmem [shape: bf16[384,128], index: 4, kind: input, shape index: {}]   ;;  %s3238_s5 = inlined_call_operand.vmem [shape: f32[1,128], index: 5, kind: input, shape index: {}]   ;;  %s3239_s6 = inlined_call_operand.vmem [shape: f32[1,128], index: 6, kind: input, shape index: {}]   ;;  %s3240_s7 = inlined_call_operand.vmem [shape: f32[1,128], index: 7, kind: input, shape index: {}]   ;;  %s3241_s8 = inlined_call_operand.vmem [shape: f32[1,128], index: 8, kind: input, shape index: {}]   ;;  %s3242_s9 = inlined_call_operand.vmem [shape: f32[1,128], index: 9, kind: input, shape index: {}]   ;;  %s3243_s10 = inlined_call_operand.vmem [shape: f32[1,128], index: 10, kind: input, shape index: {}]   ;;  %s3244_s11 = inlined_call_operand.vmem [shape: f32[1,128], index: 11, kind: input, shape index: {}]   ;;  %s3245_s12 = inlined_call_operand.vmem [shape: f32[1,128], index: 12, kind: input, shape index: {}]   ;;  %s3246_s13 = inlined_call_operand.vmem [shape: f32[1,128], index: 13, kind: input, shape index: {}]   ;;  %s3247_s14 = inlined_call_operand.hbm [shape: f32[128,128], index: 14, kind: input, shape index: {}]   ;;  %s3248_s15 = inlined_call_operand.hbm [shape: f32[128,128], index: 15, kind: input, shape index: {}]   ;;  %s3249_s16 = inlined_call_operand.vmem [shape: bf16[16,16], index: 16, kind: input, shape index: {}]   ;;  %s3250_s17 = inlined_call_operand.vmem [shape: bf16[16,16], index: 17, kind: input, shape index: {}]   ;;  %s3251_s18 = inlined_call_operand.vmem [shape: f32[16,128], index: 18, kind: output, shape index: {}]  }
   0x1   :  { %3253 = sst [smem:[#allocation8_spill]] %s3233_s0 }
   0x2   :  { %3254 = sst [smem:[#allocation9_spill]] %s3234_s1 }
   0x3   :  { %3255 = sst [smem:[#allocation10_spill]] %s3235_s2 }
   0x4   :  { %23 = vsyncpa [#allocation3], 0 }
   0x5   :  { %24 = vsyncpa [#allocation5], 0  ;;  %s2568_s27 = smov [#allocation2]  }
   0x6   :  { %s58_s28 = sshll.u32 %s2568_s27, 4  ;;  %s59_s28 = int_to_ptr.vmem [resolvable:$true] %s58_s28 }
   0x7   :  { %s2532_s29 = scalar_lea.vmem %s59_s28, 2048  ;;  %p2537_p1 = scmp.lt.s32.totalorder %s59_s28, %s59_s28 }
   0x8   :  { %p2533_p0 = scmp.ne.s32.totalorder %s59_s28, %s2532_s29  ;;  %p2538_p2 = scmp.lt.s32.totalorder %s2532_s29, %s2532_s29 }
   0xa   :  { %p2539_p3 = por %p2538_p2, %p2537_p1 }
   0xc   :  { %p2540_p4 = pnand %p2539_p3, %p2533_p0 }
   0xe   :  { %2543 = shalt.err (!%p2540_p4)
}
   0xf   :  { %s2569_s30 = smov 128   ;;  %s2570_s0 = smov 8  }
  0x10   :  { %64 = dma.hbm_to_vmem [thread:$0]  %s3247_s14, 2048, %s59_s28, [#allocation3], %s2569_s30, %s2569_s30, %s2570_s0  }
  0x11   :  { %s2571_s20 = smov [#allocation4]  }
  0x12   :  { %s70_s21 = sshll.u32 %s2571_s20, 4  ;;  %s71_s21 = int_to_ptr.vmem [resolvable:$true] %s70_s21 }
  0x13   :  { %s2552_s22 = scalar_lea.vmem %s71_s21, 2048  ;;  %p2557_p6 = scmp.lt.s32.totalorder %s71_s21, %s71_s21 }
  0x14   :  { %p2553_p5 = scmp.ne.s32.totalorder %s71_s21, %s2552_s22  ;;  %p2558_p7 = scmp.lt.s32.totalorder %s2552_s22, %s2552_s22 }
  0x16   :  { %p2559_p8 = por %p2558_p7, %p2557_p6 }
  0x18   :  { %p2560_p9 = pnand %p2559_p8, %p2553_p5 }
  0x1a   :  { %2563 = shalt.err (!%p2560_p9)
}
  0x1b   :  { %76 = dma.hbm_to_vmem [thread:$0]  %s3248_s15, 2048, %s71_s21, [#allocation5], %s2569_s30, %s2569_s30, %s2570_s0  }
  0x1c   :  { %2564 = dma.done.wait [#allocation3], 2048  }
  0x1d   :  { %2565 = vsyncadd [#allocation3], 4294965248 }
  0x1e   :  { %2566 = dma.done.wait [#allocation5], 2048  }
  0x1f   :  { %2567 = vsyncadd [#allocation5], 4294965248  ;;  %v2572_v0 = vmov 0   ;;  %v2573_v1 = vmov 0.0   ;;  %s3256_s25 = sld [smem:[#allocation10_spill]]  ;;  %v290_v10 = vld [vmem:[#allocation2 + $0x78] sm:$0xff]  ;;  %v235_v35 = vlaneseq }
  0x20   :  { %224 = vmatprep.mubr.bf16.mxu0 %v2572_v0  ;;  %2169 = vmatprep.subr.mxu1 %v2573_v1  ;;  %v289_v12 = vld [vmem:[#allocation2 + $0x70] sm:$0xff]  ;;  %v288_v13 = vld [vmem:[#allocation2 + $0x68] sm:$0xff]  ;;  %v287_v15 = vld [vmem:[#allocation2 + $0x60] sm:$0xff]  ;;  %s3257_s26 = sld [smem:[#allocation8_spill]]  ;;  %vm2574_vm0 = vmmov 0   ;;  %vm479_vm5 = vcmask 130048  }
  0x21   :  { %2170 = vmatpush3.msra.mxu1 %v290_v10  ;;  %v286_v23 = vld [vmem:[#allocation2 + $0x58] sm:$0xff]  ;;  %v285_v24 = vld [vmem:[#allocation2 + $0x50] sm:$0xff]  ;;  %v284_v25 = vld [vmem:[#allocation2 + $0x48] sm:$0xff]  ;;  %2201 = vmatprep.mubr.msk.f32.mxu1 %vm2574_vm0, %v2573_v1  ;;  %v2764_v36 = vshrl.u32 %v235_v35, 7  ;;  %s3258_s1 = sld [smem:[#allocation9_spill]] }
  0x22   :  { %2171 = vmatprep.subr.mxu1 %v2573_v1  ;;  %v283_v26 = vld [vmem:[#allocation2 + $0x40] sm:$0xff]  ;;  %v282_v27 = vld [vmem:[#allocation2 + $0x38] sm:$0xff]  ;;  %v281_v28 = vld [vmem:[#allocation2 + $0x30] sm:$0xff] }
  0x23   :  { %2172 = vmatpush3.msra.mxu1 %v289_v12  ;;  %v280_v29 = vld [vmem:[#allocation2 + $0x28] sm:$0xff]  ;;  %v279_v30 = vld [vmem:[#allocation2 + $0x20] sm:$0xff]  ;;  %v278_v31 = vld [vmem:[#allocation2 + $0x18] sm:$0xff]  ;;  %v238_v37 = vand.u32 1, %v2764_v36  ;;  %v237_v38 = vadd.s32 8, %v2764_v36 }
  0x24   :  { %2173 = vmatprep.subr.mxu1 %v2573_v1  ;;  %v277_v32 = vld [vmem:[#allocation2 + $0x10] sm:$0xff]  ;;  %v276_v33 = vld [vmem:[#allocation2 + $0x8] sm:$0xff]  ;;  %v275_v34 = vld [vmem:[#allocation2] sm:$0xff] }
  0x25   :  { %v2418_v2 = vld [vmem:[%s3256_s25 + $0x74] ss:$8 sps:$4 sm:$0xff]   ;;  %v2420_v3 = vld [vmem:[%s3256_s25 + $0x70] ss:$8 sps:$4 sm:$0xff]   ;;  %v2421_v4 = vld [vmem:[%s3256_s25 + $0x64] ss:$8 sps:$4 sm:$0xff]   ;;  %2174 = vmatpush3.msra.mxu1 %v288_v13 }
  0x26   :  { %192 = vmatprep.subr.bf16.mxu0 %v2418_v2  ;;  %v2423_v5 = vld [vmem:[%s3256_s25 + $0x60] ss:$8 sps:$4 sm:$0xff]   ;;  %v2424_v6 = vld [vmem:[%s3256_s25 + $0x54] ss:$8 sps:$4 sm:$0xff]   ;;  %v2426_v7 = vld [vmem:[%s3256_s25 + $0x50] ss:$8 sps:$4 sm:$0xff]   ;;  %2175 = vmatprep.subr.mxu1 %v2573_v1 }
  0x27   :  { %193 = vmatpush1.bf16.msra.mxu0 %v2420_v3  ;;  %v2427_v8 = vld [vmem:[%s3256_s25 + $0x44] ss:$8 sps:$4 sm:$0xff]   ;;  %v2429_v9 = vld [vmem:[%s3256_s25 + $0x40] ss:$8 sps:$4 sm:$0xff]   ;;  %v2430_v11 = vld [vmem:[%s3256_s25 + $0x34] ss:$8 sps:$4 sm:$0xff]   ;;  %2176 = vmatpush3.msra.mxu1 %v287_v15 }
  0x28   :  { %194 = vmatprep.subr.bf16.mxu0 %v2421_v4  ;;  %v2432_v14 = vld [vmem:[%s3256_s25 + $0x30] ss:$8 sps:$4 sm:$0xff]   ;;  %v2433_v16 = vld [vmem:[%s3256_s25 + $0x24] ss:$8 sps:$4 sm:$0xff]   ;;  %v2435_v17 = vld [vmem:[%s3256_s25 + $0x20] ss:$8 sps:$4 sm:$0xff]   ;;  %2177 = vmatprep.subr.mxu1 %v2573_v1 }
  0x29   :  { %v2436_v18 = vld [vmem:[%s3256_s25 + $0x14] ss:$8 sps:$4 sm:$0xff]   ;;  %v2438_v19 = vld [vmem:[%s3256_s25 + $0x10] ss:$8 sps:$4 sm:$0xff]   ;;  %v2439_v20 = vld [vmem:[%s3256_s25 + $0x4] ss:$8 sps:$4 sm:$0xff]   ;;  %2178 = vmatpush3.msra.mxu1 %v286_v23 }
  0x2a   :  { %v2441_v21 = vld [vmem:[%s3256_s25] ss:$8 sps:$4 sm:$0xff]   ;;  %2179 = vmatprep.subr.mxu1 %v2573_v1  ;;  %vm240_vm1 = vcmp.eq.s32.totalorder %v238_v37, 0  ;;  %v239_v40 = vand.u32 1, %v237_v38  ;;  %v2448_v3 = vld [vmem:[%s3236_s3 + $0xf8] sm:$0xff]  }
  0x2b   :  { %195 = vmatpush1.bf16.msra.mxu0 %v2423_v5  ;;  %v2442_v22 = vld [vmem:[%s3257_s26] sm:$0xff]   ;;  %2180 = vmatpush3.msra.mxu1 %v285_v24  ;;  %v2450_v4 = vld [vmem:[%s3236_s3 + $0xb8] sm:$0xff]   ;;  %v2452_v5 = vld [vmem:[%s3236_s3 + $0xf0] sm:$0xff]  }
  0x2c   :  { %196 = vmatprep.subr.bf16.mxu0 %v2424_v6  ;;  %2181 = vmatprep.subr.mxu1 %v2573_v1  ;;  %v1884_v43 = vld [vmem:[%s3238_s5] ss:$0 sm:$0xff]  ;;  %vm241_vm2 = vcmp.eq.s32.totalorder %v239_v40, 0  ;;  %v2454_v6 = vld [vmem:[%s3236_s3 + $0xb0] sm:$0xff]  }
  0x2d   :  { %2182 = vmatpush3.msra.mxu1 %v284_v25  ;;  %v2443_v40 = vld [vmem:[%s3258_s1] sm:$0xff]  }
  0x2e   :  { %2183 = vmatprep.subr.mxu1 %v2573_v1 }
  0x2f   :  { %197 = vmatpush1.bf16.msra.mxu0 %v2426_v7  ;;  %2184 = vmatpush3.msra.mxu1 %v283_v26  ;;  %v2456_v7 = vld [vmem:[%s3236_s3 + $0xe8] sm:$0xff]  }
  0x30   :  { %198 = vmatprep.subr.bf16.mxu0 %v2427_v8  ;;  %2185 = vmatprep.subr.mxu1 %v2573_v1  ;;  %v2458_v8 = vld [vmem:[%s3236_s3 + $0xa8] sm:$0xff]  }
  0x31   :  { %2186 = vmatpush3.msra.mxu1 %v282_v27 }
  0x32   :  { %2187 = vmatprep.subr.mxu1 %v2573_v1 }
  0x33   :  { %199 = vmatpush1.bf16.msra.mxu0 %v2429_v9  ;;  %2188 = vmatpush3.msra.mxu1 %v281_v28  ;;  %v2460_v9 = vld [vmem:[%s3236_s3 + $0xe0] sm:$0xff]  }
  0x34   :  { %200 = vmatprep.subr.bf16.mxu0 %v2430_v11  ;;  %2189 = vmatprep.subr.mxu1 %v2573_v1  ;;  %v2464_v11 = vld [vmem:[%s3236_s3 + $0xd8] sm:$0xff]  }
  0x35   :  { %2190 = vmatpush3.msra.mxu1 %v280_v29 }
  0x36   :  { %2191 = vmatprep.subr.mxu1 %v2573_v1 }
  0x37   :  { %201 = vmatpush1.bf16.msra.mxu0 %v2432_v14  ;;  %2192 = vmatpush3.msra.mxu1 %v279_v30 }
  0x38   :  { %202 = vmatprep.subr.bf16.mxu0 %v2433_v16  ;;  %2193 = vmatprep.subr.mxu1 %v2573_v1 }
  0x39   :  { %2194 = vmatpush3.msra.mxu1 %v278_v31 }
  0x3a   :  { %2195 = vmatprep.subr.mxu1 %v2573_v1 }
  0x3b   :  { %203 = vmatpush1.bf16.msra.mxu0 %v2435_v17  ;;  %2196 = vmatpush3.msra.mxu1 %v277_v32 }
  0x3c   :  { %204 = vmatprep.subr.bf16.mxu0 %v2436_v18  ;;  %2197 = vmatprep.subr.mxu1 %v2573_v1 }
  0x3d   :  { %2198 = vmatpush3.msra.mxu1 %v276_v33 }
  0x3e   :  { %2199 = vmatprep.subr.mxu1 %v2573_v1 }
  0x3f   :  { %205 = vmatpush1.bf16.msra.mxu0 %v2438_v19  ;;  %2200 = vmatpush3.msra.mxu1 %v275_v34 }
  0x40   :  { %206 = vmatprep.subr.bf16.mxu0 %v2439_v20 }
  0x43   :  { %207 = vmatpush1.bf16.msra.mxu0 %v2441_v21 }
  0x44   :  { %2204 = vmatprep.subr.mxu0 %v2573_v1 }
  0x46   :  { %225 = vmatmul.mubr.bf16.vlgmr.msra.gmra.mxu0 %v2442_v22 }
  0x47   :  { %2205 = vmatpush3.msra.mxu0 %v290_v10  ;;  %2236 = vmatprep.mubr.msk.f32.mxu0 %vm2574_vm0, %v2573_v1  ;;  %v2462_v10 = vld [vmem:[%s3236_s3 + $0xa0] sm:$0xff]  }
  0x48   :  { %2206 = vmatprep.subr.mxu0 %v2573_v1 }
  0x49   :  { %2207 = vmatpush3.msra.mxu0 %v289_v12  ;;  %v2466_v12 = vld [vmem:[%s3236_s3 + $0x98] sm:$0xff]  }
  0x4a   :  { %2208 = vmatprep.subr.mxu0 %v2573_v1 }
  0x4b   :  { %2209 = vmatpush3.msra.mxu0 %v288_v13 }
  0x4c   :  { %2210 = vmatprep.subr.mxu0 %v2573_v1 }
  0x4d   :  { %2211 = vmatpush3.msra.mxu0 %v287_v15 }
  0x4e   :  { %2212 = vmatprep.subr.mxu0 %v2573_v1 }
  0x4f   :  { %2213 = vmatpush3.msra.mxu0 %v286_v23  ;;  %v257_v23 = vld [vmem:[%s3241_s8] sm:$0x1] }
  0x50   :  { %2214 = vmatprep.subr.mxu0 %v2573_v1 }
  0x51   :  { %2215 = vmatpush3.msra.mxu0 %v285_v24  ;;  %v2806_v24 = vsub.s32 0, %v2764_v36 }
  0x52   :  { %2216 = vmatprep.subr.mxu0 %v2573_v1 }
  0x53   :  { %2217 = vmatpush3.msra.mxu0 %v284_v25 }
  0x54   :  { %2218 = vmatprep.subr.mxu0 %v2573_v1 }
  0x55   :  { %2219 = vmatpush3.msra.mxu0 %v283_v26 }
  0x56   :  { %2220 = vmatprep.subr.mxu0 %v2573_v1 }
  0x57   :  { %2221 = vmatpush3.msra.mxu0 %v282_v27  ;;  %v258_v27 = vld [vmem:[%s3242_s9] sm:$0x1] }
  0x58   :  { %2222 = vmatprep.subr.mxu0 %v2573_v1 }
  0x59   :  { %2223 = vmatpush3.msra.mxu0 %v281_v28 }
  0x5a   :  { %2224 = vmatprep.subr.mxu0 %v2573_v1 }
  0x5b   :  { %2225 = vmatpush3.msra.mxu0 %v280_v29 }
  0x5c   :  { %2226 = vmatprep.subr.mxu0 %v2573_v1 }
  0x5d   :  { %2227 = vmatpush3.msra.mxu0 %v279_v30 }
  0x5e   :  { %2228 = vmatprep.subr.mxu0 %v2573_v1 }
  0x5f   :  { %2229 = vmatpush3.msra.mxu0 %v278_v31 }
  0x60   :  { %2230 = vmatprep.subr.mxu0 %v2573_v1 }
  0x61   :  { %2231 = vmatpush3.msra.mxu0 %v277_v32 }
  0x62   :  { %2232 = vmatprep.subr.mxu0 %v2573_v1 }
  0x63   :  { %2233 = vmatpush3.msra.mxu0 %v276_v33 }
  0x64   :  { %2234 = vmatprep.subr.mxu0 %v2573_v1 }
  0x65   :  { %2235 = vmatpush3.msra.mxu0 %v275_v34 }
  0x66   :  { %2022 = vmatprep.subr.bf16.mxu0 %v2448_v3  ;;  %v2478_v3 = vld [vmem:[%s3236_s3 + $0x178] sm:$0xff]  }
 0x106   :  { %v226_v39 = vpop.f32.mrf.mxu0 }
 0x108   :  { %v228_v41 = vpop.f32.mrf.mxu0 }
 0x109   :  { %v246_v42 = vsel %vm240_vm1, %v226_v39, %v228_v41 }
 0x10a   :  { %v230_v44 = vpop.f32.mrf.mxu0  ;;  %v255_v45 = vadd.f32 %v1884_v43, %v246_v42  ;;  %v2819_v42 = vld [vmem:[%s3249_s16] sm:$0xff]  }
 0x10c   :  { %v232_v46 = vpop.f32.mrf.mxu0  ;;  %v266_v49 = vmul.f32 %v255_v45, %v255_v45 }
 0x10d   :  { %v247_v47 = vsel %vm241_vm2, %v230_v44, %v232_v46  ;;  %v2830_v44 = vld [vmem:[%s3250_s17] sm:$0xff]   ;;  %v2449_v46 = vld [vmem:[%s3236_s3 + $0x70] sm:$0xff]  }
 0x10e   :  { %v256_v48 = vadd.f32 %v1884_v43, %v247_v47  ;;  %v2446_v43 = vld [vmem:[%s3236_s3 + $0x78] sm:$0xff]   ;;  %v2453_v47 = vld [vmem:[%s3236_s3 + $0x68] sm:$0xff]  }
 0x110   :  { %v259_v50 = vadd.f32 %v256_v48, %v255_v45  ;;  %v267_v51 = vmul.f32 %v256_v48, %v256_v48 }
 0x112   :  { %v260_v52 = vrot.slane %v259_v50, 4  ;;  %v268_v53 = vadd.f32 %v267_v51, %v266_v49  ;;  %v2457_v49 = vld [vmem:[%s3236_s3 + $0x60] sm:$0xff]   ;;  %v2461_v51 = vld [vmem:[%s3236_s3 + $0x58] sm:$0xff]  }
 0x114   :  { %v269_v54 = vrot.slane %v268_v53, 4  ;;  %v261_v55 = vadd.f32 %v260_v52, %v259_v50  ;;  %v2459_v50 = vld [vmem:[%s3236_s3 + $0x20] sm:$0xff]   ;;  %v2463_v52 = vld [vmem:[%s3236_s3 + $0x18] sm:$0xff]  }
 0x116   :  { %v270_v56 = vadd.f32 %v269_v54, %v268_v53  ;;  %v262_v57 = vrot.slane %v261_v55, 2  ;;  %v2465_v53 = vld [vmem:[%s3236_s3 + $0x50] sm:$0xff]  }
 0x117   :  { %v2467_v54 = vld [vmem:[%s3236_s3 + $0x10] sm:$0xff]  }
 0x118   :  { %v263_v58 = vadd.f32 %v262_v57, %v261_v55  ;;  %v271_v59 = vrot.slane %v270_v56, 2  ;;  %v2468_v55 = vld [vmem:[%s3236_s3 + $0xd0] sm:$0xff]  }
 0x119   :  { %v2470_v57 = vld [vmem:[%s3236_s3 + $0x90] sm:$0xff]  }
 0x11a   :  { %v264_v60 = vrot.slane %v263_v58, 1  ;;  %v272_v61 = vadd.f32 %v271_v59, %v270_v56  ;;  %v2469_v56 = vld [vmem:[%s3236_s3 + $0x48] sm:$0xff]  }
 0x11b   :  { %v2472_v59 = vld [vmem:[%s3236_s3 + $0xc8] sm:$0xff]  }
 0x11c   :  { %v265_v62 = vadd.f32 %v264_v60, %v263_v58  ;;  %v273_v63 = vrot.slane %v272_v61, 1  ;;  %v2471_v58 = vld [vmem:[%s3236_s3 + $0x8] sm:$0xff]   ;;  %v2473_v60 = vld [vmem:[%s3236_s3 + $0x40] sm:$0xff]  }
 0x11e   :  { %2202 = vmatmul.mubr.f32.vlgmr.msra.gmra.mxu1 %v265_v62  ;;  %v274_v2 = vadd.f32 %v273_v63, %v272_v61  ;;  %v2474_v61 = vld [vmem:[%s3236_s3 + $0x88] sm:$0xff]   ;;  %v2475_v62 = vld [vmem:[%s3236_s3] sm:$0xff]  }
 0x11f   :  { %515 = vmatprep.mubr.bf16.mxu1 %v2572_v0  ;;  %v2476_v63 = vld [vmem:[%s3236_s3 + $0xc0] sm:$0xff]  }
 0x120   :  { %2237 = vmatmul.mubr.f32.vlgmr.msra.gmra.mxu0 %v274_v2  ;;  %v2477_v2 = vld [vmem:[%s3236_s3 + $0x80] sm:$0xff]  }
 0x121   :  { %2023 = vmatpush3.bf16.msra.mxu0 %v2450_v4 }
 0x122   :  { %2024 = vmatprep.subr.bf16.mxu0 %v2452_v5 }
 0x125   :  { %2025 = vmatpush3.bf16.msra.mxu0 %v2454_v6 }
 0x126   :  { %2026 = vmatprep.subr.bf16.mxu0 %v2456_v7 }
 0x129   :  { %2027 = vmatpush3.bf16.msra.mxu0 %v2458_v8 }
 0x12a   :  { %2028 = vmatprep.subr.bf16.mxu0 %v2460_v9  ;;  %v2479_v9 = vld [vmem:[%s3236_s3 + $0x138] sm:$0xff]  }
 0x12d   :  { %2029 = vmatpush3.bf16.msra.mxu0 %v2462_v10 }
 0x12e   :  { %2030 = vmatprep.subr.bf16.mxu0 %v2464_v11  ;;  %v2480_v11 = vld [vmem:[%s3236_s3 + $0x170] sm:$0xff]  }
 0x131   :  { %2031 = vmatpush3.bf16.msra.mxu0 %v2466_v12 }
 0x132   :  { %2032 = vmatprep.subr.bf16.mxu0 %v2468_v55 }
 0x135   :  { %2033 = vmatpush3.bf16.msra.mxu0 %v2470_v57  ;;  %v1890_v57 = vld [vmem:[%s3239_s6] ss:$0 sm:$0xff] }
 0x136   :  { %2034 = vmatprep.subr.bf16.mxu0 %v2472_v59 }
 0x139   :  { %2035 = vmatpush3.bf16.msra.mxu0 %v2474_v61 }
 0x13a   :  { %2036 = vmatprep.subr.bf16.mxu0 %v2476_v63 }
 0x13d   :  { %2037 = vmatpush3.bf16.msra.mxu0 %v2477_v2 }
 0x13e   :  { %2239 = vmatprep.subr.mxu0 %v2573_v1 }
 0x1de   :  { %v357_v13 = vpop.f32.mrf.mxu1 }
 0x1df   :  { %v361_v14 = vmul.f32 0.001953125, %v357_v13 }
 0x1e0   :  { %v2203_v15 = vpop.f32.mrf.mxu1  ;;  %v428_v16 = vpop.f32.mrf.mxu0 }
 0x1e1   :  { %v433_v17 = vmul.f32 %v361_v14, %v361_v14  ;;  %v432_v18 = vmul.f32 0.001953125, %v428_v16  ;;  %v2482_v15 = vld [vmem:[%s3236_s3 + $0x168] sm:$0xff]  }
 0x1e2   :  { %v2238_v19 = vpop.f32.mrf.mxu0 }
 0x1e3   :  { %v434_v20 = vsub.f32 %v432_v18, %v433_v17  ;;  %v2483_v18 = vld [vmem:[%s3236_s3 + $0x128] sm:$0xff]  }
 0x1e5   :  { %v435_v21 = vmax.f32 %v434_v20, 0.0  ;;  %v2484_v20 = vld [vmem:[%s3236_s3 + $0x160] sm:$0xff]  }
 0x1e7   :  { %v436_v22 = vadd.f32 1e-05, %v435_v21  ;;  %v2485_v21 = vld [vmem:[%s3236_s3 + $0x120] sm:$0xff]  }
 0x1e9   :  { %2518 = vrsqrt.f32 %v436_v22  ;;  %v2486_v22 = vld [vmem:[%s3236_s3 + $0x158] sm:$0xff]  }
 0x1f6   :  { %v2519_v25 = vpop.eup %2518 }
 0x1f7   :  { %v438_v26 = vmul.f32 %v2519_v25, %v257_v23  ;;  %v2487_v23 = vld [vmem:[%s3236_s3 + $0x118] sm:$0xff]   ;;  %v2488_v25 = vld [vmem:[%s3236_s3 + $0x150] sm:$0xff]  }
 0x1f9   :  { %v439_v28 = vmul.f32 %v438_v26, %v361_v14  ;;  %v445_v29 = vrot.slane %v438_v26, %v2806_v24  ;;  %v2481_v14 = vld [vmem:[%s3236_s3 + $0x130] sm:$0xff]  }
 0x1fa   :  { %v2489_v26 = vld [vmem:[%s3236_s3 + $0x110] sm:$0xff]  }
 0x1fb   :  { %v440_v30 = vsub.f32 %v258_v27, %v439_v28  ;;  %v447_v31 = vmul.f32 %v445_v29, %v255_v45  ;;  %v448_v32 = vmul.f32 %v445_v29, %v256_v48  ;;  %v2447_v45 = vld [vmem:[%s3236_s3 + $0x38] sm:$0xff]   ;;  %v2455_v48 = vld [vmem:[%s3236_s3 + $0x28] sm:$0xff]   ;;  %v2492_v29 = vld [vmem:[%s3236_s3 + $0x140] sm:$0xff]  }
 0x1fc   :  { %v2490_v27 = vld [vmem:[%s3236_s3 + $0x148] sm:$0xff]  }
 0x1fd   :  { %v453_v33 = vrot.slane %v440_v30, %v2806_v24  ;;  %v2491_v28 = vld [vmem:[%s3236_s3 + $0x108] sm:$0xff]   ;;  %v2493_v30 = vld [vmem:[%s3236_s3 + $0x100] sm:$0xff]  }
 0x1ff   :  { %v455_v34 = vadd.f32 %v453_v33, %v447_v31  ;;  %v456_v35 = vadd.f32 %v453_v33, %v448_v32  ;;  %v2951_v32 = vld [vmem:[#allocation4 + $0x78] sm:$0xff]  ;;  %v2953_v33 = vld [vmem:[#allocation4 + $0x70] sm:$0xff] }
 0x201   :  { %vm457_vm3 = vcmp.ge.f32.partialorder %v455_v34, 0.0  ;;  %vm458_vm4 = vcmp.ge.f32.partialorder %v456_v35, 0.0  ;;  %v459_v36 = vmul.f32 0.01, %v455_v34  ;;  %v460_v37 = vmul.f32 0.01, %v456_v35 }
 0x203   :  { %v461_v38 = vsel %vm457_vm3, %v455_v34, %v459_v36  ;;  %v462_v39 = vsel %vm458_vm4, %v456_v35, %v460_v37  ;;  %v2959_v34 = vld [vmem:[#allocation4 + $0x68] sm:$0xff]  ;;  %v2969_v35 = vld [vmem:[#allocation4 + $0x60] sm:$0xff]  ;;  %v2974_v36 = vld [vmem:[#allocation4 + $0x58] sm:$0xff] }
 0x204   :  { %v465_v41 = vpack.c.bf16 %v462_v39, %v461_v38  ;;  %v2980_v37 = vld [vmem:[#allocation4 + $0x50] sm:$0xff]  ;;  %v2986_v38 = vld [vmem:[#allocation4 + $0x48] sm:$0xff]  ;;  %v2992_v39 = vld [vmem:[#allocation4 + $0x40] sm:$0xff] }
 0x206   :  { %497 = vmatprep.subr.bf16.mxu1 %v465_v41  ;;  %1047 = vmatprep.mubr.bf16.mxu0 %v465_v41 }
 0x207   :  { %498 = vmatpush1.bf16.msra.mxu1 %v2443_v40  ;;  %1048 = vmatmul.mubr.bf16.vlgmr.msra.gmra.mxu0 %v2443_v40 }
 0x208   :  { %552 = vmatprep.subr.bf16.mxu1 %v465_v41  ;;  %2271 = vmatprep.mubr.msk.f32.mxu0 %vm2574_vm0, %v2573_v1  ;;  %v3004_v41 = vld [vmem:[#allocation4 + $0x30] sm:$0xff] }
 0x209   :  { %2240 = vmatpush3.msra.mxu0 %v2951_v32 }
 0x20a   :  { %1887 = vmatmul.mubr.msk.bf16.vlgmr.msra.gmra.mxu1 %vm479_vm5, %v2819_v42  ;;  %2241 = vmatprep.subr.mxu0 %v2573_v1 }
 0x20b   :  { %553 = vmatpush1.bf16.msra.mxu1 %v2443_v40  ;;  %570 = vmatprep.mubr.bf16.mxu1 %v2572_v0  ;;  %v2451_v0 = vld [vmem:[%s3236_s3 + $0x30] sm:$0xff]   ;;  %v2998_v40 = vld [vmem:[#allocation4 + $0x38] sm:$0xff] }
 0x20c   :  { %2000 = vmatprep.subr.bf16.mxu1 %v2446_v43  ;;  %2242 = vmatpush3.msra.mxu0 %v2953_v33  ;;  %v3010_v43 = vld [vmem:[#allocation4 + $0x28] sm:$0xff] }
 0x20d   :  { %2243 = vmatprep.subr.mxu0 %v2573_v1 }
 0x20e   :  { %2244 = vmatpush3.msra.mxu0 %v2959_v34 }
 0x20f   :  { %2245 = vmatprep.subr.mxu0 %v2573_v1 }
 0x210   :  { %2246 = vmatpush3.msra.mxu0 %v2969_v35 }
 0x211   :  { %2247 = vmatprep.subr.mxu0 %v2573_v1 }
 0x212   :  { %1889 = vmatmul.mubr.msk.bf16.vlgmr.msra.gmra.mxu1 %vm479_vm5, %v2830_v44  ;;  %2248 = vmatpush3.msra.mxu0 %v2974_v36 }
 0x213   :  { %2001 = vmatpush3.bf16.msra.mxu1 %v2447_v45  ;;  %2249 = vmatprep.subr.mxu0 %v2573_v1  ;;  %v3016_v45 = vld [vmem:[#allocation4 + $0x20] sm:$0xff] }
 0x214   :  { %2002 = vmatprep.subr.bf16.mxu1 %v2449_v46  ;;  %2250 = vmatpush3.msra.mxu0 %v2980_v37  ;;  %v3022_v46 = vld [vmem:[#allocation4 + $0x18] sm:$0xff] }
 0x215   :  { %2251 = vmatprep.subr.mxu0 %v2573_v1 }
 0x216   :  { %2252 = vmatpush3.msra.mxu0 %v2986_v38 }
 0x217   :  { %2003 = vmatpush3.bf16.msra.mxu1 %v2451_v0  ;;  %2253 = vmatprep.subr.mxu0 %v2573_v1  ;;  %v3025_v0 = vld [vmem:[#allocation4 + $0x10] sm:$0xff] }
 0x218   :  { %2004 = vmatprep.subr.bf16.mxu1 %v2453_v47  ;;  %2254 = vmatpush3.msra.mxu0 %v2992_v39  ;;  %v3031_v47 = vld [vmem:[#allocation4 + $0x8] sm:$0xff] }
 0x219   :  { %2255 = vmatprep.subr.mxu0 %v2573_v1 }
 0x21a   :  { %2256 = vmatpush3.msra.mxu0 %v2998_v40 }
 0x21b   :  { %2005 = vmatpush3.bf16.msra.mxu1 %v2455_v48  ;;  %2257 = vmatprep.subr.mxu0 %v2573_v1  ;;  %v3037_v48 = vld [vmem:[#allocation4] sm:$0xff] }
 0x21c   :  { %2006 = vmatprep.subr.bf16.mxu1 %v2457_v49  ;;  %2258 = vmatpush3.msra.mxu0 %v3004_v41 }
 0x21d   :  { %2259 = vmatprep.subr.mxu0 %v2573_v1 }
 0x21e   :  { %2260 = vmatpush3.msra.mxu0 %v3010_v43 }
 0x21f   :  { %2007 = vmatpush3.bf16.msra.mxu1 %v2459_v50  ;;  %2261 = vmatprep.subr.mxu0 %v2573_v1 }
 0x220   :  { %2008 = vmatprep.subr.bf16.mxu1 %v2461_v51  ;;  %2262 = vmatpush3.msra.mxu0 %v3016_v45 }
 0x221   :  { %2263 = vmatprep.subr.mxu0 %v2573_v1 }
 0x222   :  { %2264 = vmatpush3.msra.mxu0 %v3022_v46 }
 0x223   :  { %2009 = vmatpush3.bf16.msra.mxu1 %v2463_v52  ;;  %2265 = vmatprep.subr.mxu0 %v2573_v1 }
 0x224   :  { %2010 = vmatprep.subr.bf16.mxu1 %v2465_v53  ;;  %2266 = vmatpush3.msra.mxu0 %v3025_v0 }
 0x225   :  { %2267 = vmatprep.subr.mxu0 %v2573_v1 }
 0x226   :  { %2268 = vmatpush3.msra.mxu0 %v3031_v47 }
 0x227   :  { %2011 = vmatpush3.bf16.msra.mxu1 %v2467_v54  ;;  %2269 = vmatprep.subr.mxu0 %v2573_v1 }
 0x228   :  { %2012 = vmatprep.subr.bf16.mxu1 %v2469_v56  ;;  %2270 = vmatpush3.msra.mxu0 %v3037_v48 }
 0x229   :  { %2309 = vmatprep.subr.bf16.mxu0 %v2573_v1 }
 0x22b   :  { %2013 = vmatpush3.bf16.msra.mxu1 %v2471_v58 }
 0x22c   :  { %2014 = vmatprep.subr.bf16.mxu1 %v2473_v60 }
 0x22f   :  { %2015 = vmatpush3.bf16.msra.mxu1 %v2475_v62 }
 0x230   :  { %2044 = vmatprep.subr.bf16.mxu1 %v2478_v3 }
 0x2c7   :  { %v2038_v51 = vpop.f32.mrf.mxu0 }
 0x2c9   :  { %v2039_v53 = vpop.f32.mrf.mxu0 }
 0x2ca   :  { %v517_v4 = vpop.f32.mrf.mxu1  ;;  %v2040_v62 = vadd.f32 %v2039_v53, %v2038_v51 }
 0x2cb   :  { %v2041_v55 = vpop.f32.mrf.mxu0 }
 0x2cc   :  { %v519_v5 = vpop.f32.mrf.mxu1 }
 0x2cd   :  { %v2042_v59 = vpop.f32.mrf.mxu0 }
 0x2ce   :  { %v521_v6 = vpop.f32.mrf.mxu1  ;;  %v2043_v3 = vadd.f32 %v2042_v59, %v2041_v55 }
 0x2cf   :  { %v526_v10 = vpack.c.bf16 %v521_v6, %v517_v4 }
 0x2d0   :  { %v523_v7 = vpop.f32.mrf.mxu1 }
 0x2d1   :  { %v527_v8 = vpack.c.bf16 %v523_v7, %v519_v5 }
 0x2d2   :  { %v572_v12 = vpop.f32.mrf.mxu1 }
 0x2d3   :  { %1006 = vmatprep.mubr.bf16.mxu1 %v527_v8 }
 0x2d4   :  { %1007 = vmatmul.mubr.bf16.vlgmr.msra.gmra.mxu1 %v526_v10  ;;  %v574_v13 = vpop.f32.mrf.mxu1 }
 0x2d5   :  { %2045 = vmatpush3.bf16.msra.mxu1 %v2479_v9 }
 0x2d6   :  { %2046 = vmatprep.subr.bf16.mxu1 %v2480_v11  ;;  %v576_v16 = vpop.f32.mrf.mxu1 }
 0x2d7   :  { %v581_v31 = vpack.c.bf16 %v576_v16, %v572_v12 }
 0x2d8   :  { %v578_v17 = vpop.f32.mrf.mxu1 }
 0x2d9   :  { %2047 = vmatpush3.bf16.msra.mxu1 %v2481_v14  ;;  %v582_v19 = vpack.c.bf16 %v578_v17, %v574_v13 }
 0x2da   :  { %2048 = vmatprep.subr.bf16.mxu1 %v2482_v15 }
 0x2db   :  { %1088 = vmatprep.mubr.bf16.mxu1 %v582_v19 }
 0x2dd   :  { %2049 = vmatpush3.bf16.msra.mxu1 %v2483_v18 }
 0x2de   :  { %2050 = vmatprep.subr.bf16.mxu1 %v2484_v20 }
 0x2e1   :  { %2051 = vmatpush3.bf16.msra.mxu1 %v2485_v21 }
 0x2e2   :  { %2052 = vmatprep.subr.bf16.mxu1 %v2486_v22 }
 0x2e5   :  { %2053 = vmatpush3.bf16.msra.mxu1 %v2487_v23 }
 0x2e6   :  { %2054 = vmatprep.subr.bf16.mxu1 %v2488_v25 }
 0x2e9   :  { %2055 = vmatpush3.bf16.msra.mxu1 %v2489_v26 }
 0x2ea   :  { %2056 = vmatprep.subr.bf16.mxu1 %v2490_v27 }
 0x2ed   :  { %2057 = vmatpush3.bf16.msra.mxu1 %v2491_v28 }
 0x2ee   :  { %2058 = vmatprep.subr.bf16.mxu1 %v2492_v29  ;;  %v2500_v29 = vld [vmem:[%s3237_s4 + $0xb8] sm:$0xff]  }
 0x2f1   :  { %2059 = vmatpush3.bf16.msra.mxu1 %v2493_v30  ;;  %v2503_v30 = vld [vmem:[%s3237_s4 + $0xb0] sm:$0xff]  }
 0x2f2   :  { %2274 = vmatprep.subr.mxu1 %v2573_v1 }
 0x2f4   :  { %1089 = vmatmul.mubr.bf16.vlgmr.msra.gmra.mxu1 %v581_v31  ;;  %v2506_v31 = vld [vmem:[%s3237_s4 + $0xa8] sm:$0xff]  }
 0x2f5   :  { %2306 = vmatprep.mubr.msk.f32.mxu1 %vm2574_vm0, %v2573_v1  ;;  %2275 = vmatpush3.msra.mxu1 %v2951_v32 }
 0x2f6   :  { %2276 = vmatprep.subr.mxu1 %v2573_v1 }
 0x2f7   :  { %2277 = vmatpush3.msra.mxu1 %v2953_v33 }
 0x2f8   :  { %2278 = vmatprep.subr.mxu1 %v2573_v1 }
 0x2f9   :  { %2279 = vmatpush3.msra.mxu1 %v2959_v34 }
 0x2fa   :  { %2280 = vmatprep.subr.mxu1 %v2573_v1 }
 0x2fb   :  { %2281 = vmatpush3.msra.mxu1 %v2969_v35 }
 0x2fc   :  { %2282 = vmatprep.subr.mxu1 %v2573_v1 }
 0x2fd   :  { %2283 = vmatpush3.msra.mxu1 %v2974_v36 }
 0x2fe   :  { %2284 = vmatprep.subr.mxu1 %v2573_v1 }
 0x2ff   :  { %2285 = vmatpush3.msra.mxu1 %v2980_v37 }
 0x300   :  { %2286 = vmatprep.subr.mxu1 %v2573_v1 }
 0x301   :  { %2287 = vmatpush3.msra.mxu1 %v2986_v38 }
 0x302   :  { %2288 = vmatprep.subr.mxu1 %v2573_v1 }
 0x303   :  { %2289 = vmatpush3.msra.mxu1 %v2992_v39 }
 0x304   :  { %2290 = vmatprep.subr.mxu1 %v2573_v1 }
 0x305   :  { %2291 = vmatpush3.msra.mxu1 %v2998_v40 }
 0x306   :  { %2292 = vmatprep.subr.mxu1 %v2573_v1 }
 0x307   :  { %2293 = vmatpush3.msra.mxu1 %v3004_v41 }
 0x308   :  { %2294 = vmatprep.subr.mxu1 %v2573_v1 }
 0x309   :  { %2295 = vmatpush3.msra.mxu1 %v3010_v43 }
 0x30a   :  { %2296 = vmatprep.subr.mxu1 %v2573_v1 }
 0x30b   :  { %2297 = vmatpush3.msra.mxu1 %v3016_v45 }
 0x30c   :  { %2298 = vmatprep.subr.mxu1 %v2573_v1 }
 0x30d   :  { %2299 = vmatpush3.msra.mxu1 %v3022_v46 }
 0x30e   :  { %2300 = vmatprep.subr.mxu1 %v2573_v1 }
 0x30f   :  { %2301 = vmatpush3.msra.mxu1 %v3025_v0 }
 0x310   :  { %2302 = vmatprep.subr.mxu1 %v2573_v1 }
 0x311   :  { %2303 = vmatpush3.msra.mxu1 %v3031_v47 }
 0x312   :  { %2304 = vmatprep.subr.mxu1 %v2573_v1 }
 0x313   :  { %2305 = vmatpush3.msra.mxu1 %v3037_v48 }
 0x314   :  { %2321 = vmatprep.subr.bf16.mxu1 %v2573_v1 }
 0x394   :  { %v2016_v49 = vpop.f32.mrf.mxu1 }
 0x396   :  { %v2017_v50 = vpop.f32.mrf.mxu1 }
 0x397   :  { %v2018_v56 = vadd.f32 %v2017_v50, %v2016_v49  ;;  %v2509_v49 = vld [vmem:[%s3237_s4 + $0xa0] sm:$0xff]  }
 0x398   :  { %v2019_v52 = vpop.f32.mrf.mxu1 }
 0x399   :  { %v1009_v61 = vadd.f32 %v2018_v56, %v1890_v57 }
 0x39a   :  { %v2020_v54 = vpop.f32.mrf.mxu1 }
 0x39b   :  { %v2021_v58 = vadd.f32 %v2020_v54, %v2019_v52  ;;  %v1050_v6 = vadd.f32 %v2040_v62, %v1009_v61 }
 0x39d   :  { %v1012_v2 = vadd.f32 %v2021_v58, %v1890_v57 }
 0x39f   :  { %v1053_v8 = vadd.f32 %v2043_v3, %v1012_v2 }
 0x3b4   :  { %v2060_v60 = vpop.f32.mrf.mxu1 }
 0x3b6   :  { %v2061_v63 = vpop.f32.mrf.mxu1 }
 0x3b7   :  { %v2062_v4 = vadd.f32 %v2061_v63, %v2060_v60  ;;  %v1097_v60 = vld [vmem:[%s3243_s10] sm:$0x1] }
 0x3b8   :  { %v2063_v5 = vpop.f32.mrf.mxu1  ;;  %v1098_v63 = vld [vmem:[%s3244_s11] sm:$0x1] }
 0x3b9   :  { %v1091_v9 = vadd.f32 %v2062_v4, %v1050_v6 }
 0x3ba   :  { %v2064_v7 = vpop.f32.mrf.mxu1 }
 0x3bb   :  { %v2065_v10 = vadd.f32 %v2064_v7, %v2063_v5  ;;  %v1106_v12 = vmul.f32 %v1091_v9, %v1091_v9 }
 0x3bd   :  { %v1094_v11 = vadd.f32 %v2065_v10, %v1053_v8 }
 0x3bf   :  { %v1099_v13 = vadd.f32 %v1094_v11, %v1091_v9  ;;  %v1107_v14 = vmul.f32 %v1094_v11, %v1094_v11 }
 0x3c1   :  { %v1100_v15 = vrot.slane %v1099_v13, 4  ;;  %v1108_v16 = vadd.f32 %v1107_v14, %v1106_v12 }
 0x3c3   :  { %v1101_v17 = vadd.f32 %v1100_v15, %v1099_v13  ;;  %v1109_v18 = vrot.slane %v1108_v16, 4 }
 0x3c5   :  { %v1102_v19 = vrot.slane %v1101_v17, 2  ;;  %v1110_v20 = vadd.f32 %v1109_v18, %v1108_v16  ;;  %v2498_v18 = vld [vmem:[%s3237_s4 + $0x68] sm:$0xff]  }
 0x3c7   :  { %v1103_v21 = vadd.f32 %v1102_v19, %v1101_v17  ;;  %v1111_v22 = vrot.slane %v1110_v20, 2  ;;  %v2494_v17 = vld [vmem:[%s3237_s4 + $0x78] sm:$0xff]   ;;  %v2499_v19 = vld [vmem:[%s3237_s4 + $0x28] sm:$0xff]  }
 0x3c9   :  { %v1104_v23 = vrot.slane %v1103_v21, 1  ;;  %v1112_v25 = vadd.f32 %v1111_v22, %v1110_v20  ;;  %v2502_v20 = vld [vmem:[%s3237_s4 + $0x20] sm:$0xff]   ;;  %v2505_v22 = vld [vmem:[%s3237_s4 + $0x18] sm:$0xff]  }
 0x3cb   :  { %v1105_v26 = vadd.f32 %v1104_v23, %v1103_v21  ;;  %v1113_v27 = vrot.slane %v1112_v25, 1  ;;  %v2504_v21 = vld [vmem:[%s3237_s4 + $0x58] sm:$0xff]   ;;  %v2507_v23 = vld [vmem:[%s3237_s4 + $0x50] sm:$0xff]  }
 0x3cd   :  { %2272 = vmatmul.mubr.f32.vlgmr.msra.gmra.mxu0 %v1105_v26  ;;  %v1114_v28 = vadd.f32 %v1113_v27, %v1112_v25  ;;  %v2508_v25 = vld [vmem:[%s3237_s4 + $0x10] sm:$0xff]   ;;  %v2510_v26 = vld [vmem:[%s3237_s4 + $0x48] sm:$0xff]  }
 0x3ce   :  { %2311 = vmatprep.mubr.msk.bf16.mxu0 %vm2574_vm0, %v2573_v1  ;;  %v2511_v27 = vld [vmem:[%s3237_s4 + $0x8] sm:$0xff]  }
 0x3cf   :  { %2307 = vmatmul.mubr.f32.vlgmr.msra.gmra.mxu1 %v1114_v28  ;;  %v2512_v28 = vld [vmem:[%s3237_s4 + $0x98] sm:$0xff]  }
 0x3d0   :  { %2337 = vmatprep.mubr.msk.bf16.mxu1 %vm2574_vm0, %v2573_v1  ;;  %2322 = vmatpush3.bf16.msra.mxu1 %v2500_v29  ;;  %v2513_v29 = vld [vmem:[%s3237_s4 + $0x40] sm:$0xff]  }
 0x3d1   :  { %2323 = vmatprep.subr.bf16.mxu1 %v2573_v1 }
 0x3d4   :  { %2324 = vmatpush3.bf16.msra.mxu1 %v2503_v30  ;;  %v2514_v30 = vld [vmem:[%s3237_s4] sm:$0xff]  }
 0x3d5   :  { %2325 = vmatprep.subr.bf16.mxu1 %v2573_v1 }
 0x3d8   :  { %2326 = vmatpush3.bf16.msra.mxu1 %v2506_v31  ;;  %v2515_v31 = vld [vmem:[%s3237_s4 + $0x90] sm:$0xff]  }
 0x3d9   :  { %2327 = vmatprep.subr.bf16.mxu1 %v2573_v1 }
 0x3dc   :  { %2328 = vmatpush3.bf16.msra.mxu1 %v2509_v49  ;;  %v2516_v49 = vld [vmem:[%s3237_s4 + $0x88] sm:$0xff]  }
 0x3dd   :  { %2329 = vmatprep.subr.bf16.mxu1 %v2573_v1 }
 0x3e0   :  { %2330 = vmatpush3.bf16.msra.mxu1 %v2512_v28 }
 0x3e1   :  { %2331 = vmatprep.subr.bf16.mxu1 %v2573_v1 }
 0x3e4   :  { %2332 = vmatpush3.bf16.msra.mxu1 %v2515_v31 }
 0x3e5   :  { %2333 = vmatprep.subr.bf16.mxu1 %v2573_v1 }
 0x3e8   :  { %2334 = vmatpush3.bf16.msra.mxu1 %v2516_v49 }
 0x3e9   :  { %2335 = vmatprep.subr.bf16.mxu1 %v2573_v1 }
 0x48d   :  { %v1197_v50 = vpop.f32.mrf.mxu0 }
 0x48e   :  { %v1201_v51 = vmul.f32 0.001953125, %v1197_v50  ;;  %v2517_v50 = vld [vmem:[%s3237_s4 + $0x80] sm:$0xff]  }
 0x48f   :  { %v2273_v52 = vpop.f32.mrf.mxu0  ;;  %v1268_v53 = vpop.f32.mrf.mxu1  ;;  %2336 = vmatpush3.bf16.msra.mxu1 %v2517_v50 }
 0x490   :  { %v1273_v54 = vmul.f32 %v1201_v51, %v1201_v51  ;;  %v1272_v55 = vmul.f32 0.001953125, %v1268_v53  ;;  %2376 = vmatprep.subr.mxu1 %v2573_v1 }
 0x491   :  { %v2308_v56 = vpop.f32.mrf.mxu1 }
 0x492   :  { %v1274_v57 = vsub.f32 %v1272_v55, %v1273_v54 }
 0x494   :  { %v1275_v58 = vmax.f32 %v1274_v57, 0.0 }
 0x496   :  { %v1276_v59 = vadd.f32 1e-05, %v1275_v58 }
 0x498   :  { %2520 = vrsqrt.f32 %v1276_v59 }
 0x4a5   :  { %v2521_v61 = vpop.eup %2520 }
 0x4a6   :  { %v1278_v62 = vmul.f32 %v2521_v61, %v1097_v60 }
 0x4a8   :  { %v1279_v2 = vmul.f32 %v1278_v62, %v1201_v51  ;;  %v1285_v3 = vrot.slane %v1278_v62, %v2806_v24 }
 0x4aa   :  { %v1280_v4 = vsub.f32 %v1098_v63, %v1279_v2  ;;  %v1287_v5 = vmul.f32 %v1285_v3, %v1091_v9  ;;  %v1288_v6 = vmul.f32 %v1285_v3, %v1094_v11  ;;  %v2495_v9 = vld [vmem:[%s3237_s4 + $0x38] sm:$0xff]   ;;  %v2496_v11 = vld [vmem:[%s3237_s4 + $0x70] sm:$0xff]  }
 0x4ac   :  { %v1293_v7 = vrot.slane %v1280_v4, %v2806_v24 }
 0x4ae   :  { %v1295_v8 = vadd.f32 %v1293_v7, %v1287_v5  ;;  %v1296_v10 = vadd.f32 %v1293_v7, %v1288_v6 }
 0x4b0   :  { %vm1297_vm6 = vcmp.ge.f32.partialorder %v1295_v8, 0.0  ;;  %vm1298_vm7 = vcmp.ge.f32.partialorder %v1296_v10, 0.0  ;;  %v1299_v12 = vmul.f32 0.01, %v1295_v8  ;;  %v1300_v13 = vmul.f32 0.01, %v1296_v10 }
 0x4b2   :  { %v1301_v14 = vsel %vm1297_vm6, %v1295_v8, %v1299_v12  ;;  %v1302_v15 = vsel %vm1298_vm7, %v1296_v10, %v1300_v13 }
 0x4b3   :  { %v1303_v16 = vpack.c.bf16 %v1302_v15, %v1301_v14 }
 0x4b5   :  { %2310 = vmatpush3.bf16.msra.mxu0 %v1303_v16 }
 0x4b6   :  { %2315 = vmatprep.subr.bf16.mxu0 %v2573_v1 }
 0x4b8   :  { %2312 = vmatmul.mubr.msk.bf16.vlgmr.msra.gmra.mxu0 %vm479_vm5, %v2819_v42  ;;  %v2497_v42 = vld [vmem:[%s3237_s4 + $0x30] sm:$0xff]  }
 0x4b9   :  { %2316 = vmatpush3.bf16.msra.mxu0 %v1303_v16  ;;  %2317 = vmatprep.mubr.msk.bf16.mxu0 %vm2574_vm0, %v2573_v1 }
 0x4ba   :  { %2104 = vmatprep.subr.bf16.mxu0 %v2494_v17 }
 0x4c0   :  { %2318 = vmatmul.mubr.msk.bf16.vlgmr.msra.gmra.mxu0 %vm479_vm5, %v2830_v44  ;;  %v2501_v44 = vld [vmem:[%s3237_s4 + $0x60] sm:$0xff]  }
 0x4c1   :  { %1619 = vmatprep.mubr.bf16.mxu0 %v1303_v16  ;;  %2105 = vmatpush3.bf16.msra.mxu0 %v2495_v9 }
 0x4c2   :  { %2106 = vmatprep.subr.bf16.mxu0 %v2496_v11 }
 0x4c5   :  { %2107 = vmatpush3.bf16.msra.mxu0 %v2497_v42 }
 0x4c6   :  { %2108 = vmatprep.subr.bf16.mxu0 %v2498_v18 }
 0x4c9   :  { %2109 = vmatpush3.bf16.msra.mxu0 %v2499_v19 }
 0x4ca   :  { %2110 = vmatprep.subr.bf16.mxu0 %v2501_v44 }
 0x4cd   :  { %2111 = vmatpush3.bf16.msra.mxu0 %v2502_v20 }
 0x4ce   :  { %2112 = vmatprep.subr.bf16.mxu0 %v2504_v21  ;;  %v1669_v21 = vld [vmem:[%s3245_s12] sm:$0x1] }
 0x4d1   :  { %2113 = vmatpush3.bf16.msra.mxu0 %v2505_v22 }
 0x4d2   :  { %2114 = vmatprep.subr.bf16.mxu0 %v2507_v23 }
 0x4d5   :  { %2115 = vmatpush3.bf16.msra.mxu0 %v2508_v25  ;;  %v1670_v25 = vld [vmem:[%s3246_s13] sm:$0x1] }
 0x4d6   :  { %2116 = vmatprep.subr.bf16.mxu0 %v2510_v26 }
 0x4d9   :  { %2117 = vmatpush3.bf16.msra.mxu0 %v2511_v27 }
 0x4da   :  { %2118 = vmatprep.subr.bf16.mxu0 %v2513_v29 }
 0x4dd   :  { %2119 = vmatpush3.bf16.msra.mxu0 %v2514_v30 }
 0x4de   :  { %2341 = vmatprep.subr.mxu0 %v2573_v1 }
 0x578   :  { %v1338_v51 = vpop.f32.mrf.mxu0 }
 0x57a   :  { %v2313_v52 = vpop.f32.mrf.mxu0 }
 0x57c   :  { %v1341_v53 = vpop.f32.mrf.mxu0 }
 0x57d   :  { %v1345_v54 = vpack.c.bf16 %v1341_v53, %v1338_v51 }
 0x57e   :  { %v2314_v55 = vpop.f32.mrf.mxu0 }
 0x57f   :  { %1620 = vmatmul.mubr.bf16.vlgmr.msra.gmra.mxu0 %v1345_v54 }
 0x580   :  { %v1380_v56 = vpop.f32.mrf.mxu0  ;;  %2342 = vmatpush3.msra.mxu0 %v2951_v32  ;;  %2373 = vmatprep.mubr.msk.f32.mxu0 %vm2574_vm0, %v2573_v1 }
 0x581   :  { %2343 = vmatprep.subr.mxu0 %v2573_v1 }
 0x582   :  { %v2319_v57 = vpop.f32.mrf.mxu0  ;;  %2344 = vmatpush3.msra.mxu0 %v2953_v33 }
 0x583   :  { %2345 = vmatprep.subr.mxu0 %v2573_v1 }
 0x584   :  { %v1383_v58 = vpop.f32.mrf.mxu0  ;;  %2346 = vmatpush3.msra.mxu0 %v2959_v34 }
 0x585   :  { %v1387_v59 = vpack.c.bf16 %v1383_v58, %v1380_v56  ;;  %2347 = vmatprep.subr.mxu0 %v2573_v1 }
 0x586   :  { %v2320_v60 = vpop.f32.mrf.mxu0  ;;  %2348 = vmatpush3.msra.mxu0 %v2969_v35 }
 0x587   :  { %2338 = vmatmul.mubr.bf16.vlgmr.msra.gmra.mxu1 %v1387_v59  ;;  %2349 = vmatprep.subr.mxu0 %v2573_v1 }
 0x588   :  { %2377 = vmatpush3.msra.mxu1 %v2951_v32  ;;  %2350 = vmatpush3.msra.mxu0 %v2974_v36 }
 0x589   :  { %2378 = vmatprep.subr.mxu1 %v2573_v1  ;;  %2351 = vmatprep.subr.mxu0 %v2573_v1 }
 0x58a   :  { %2379 = vmatpush3.msra.mxu1 %v2953_v33  ;;  %2352 = vmatpush3.msra.mxu0 %v2980_v37 }
 0x58b   :  { %2380 = vmatprep.subr.mxu1 %v2573_v1  ;;  %2353 = vmatprep.subr.mxu0 %v2573_v1 }
 0x58c   :  { %2381 = vmatpush3.msra.mxu1 %v2959_v34  ;;  %2354 = vmatpush3.msra.mxu0 %v2986_v38 }
 0x58d   :  { %2382 = vmatprep.subr.mxu1 %v2573_v1  ;;  %2355 = vmatprep.subr.mxu0 %v2573_v1 }
 0x58e   :  { %2383 = vmatpush3.msra.mxu1 %v2969_v35  ;;  %2356 = vmatpush3.msra.mxu0 %v2992_v39 }
 0x58f   :  { %2384 = vmatprep.subr.mxu1 %v2573_v1  ;;  %2357 = vmatprep.subr.mxu0 %v2573_v1 }
 0x590   :  { %2385 = vmatpush3.msra.mxu1 %v2974_v36  ;;  %2358 = vmatpush3.msra.mxu0 %v2998_v40 }
 0x591   :  { %2386 = vmatprep.subr.mxu1 %v2573_v1  ;;  %2359 = vmatprep.subr.mxu0 %v2573_v1 }
 0x592   :  { %2387 = vmatpush3.msra.mxu1 %v2980_v37  ;;  %2360 = vmatpush3.msra.mxu0 %v3004_v41  ;;  %v1941_v37 = vld [vmem:[%s3240_s7] ss:$0 sm:$0xff] }
 0x593   :  { %2388 = vmatprep.subr.mxu1 %v2573_v1  ;;  %2361 = vmatprep.subr.mxu0 %v2573_v1 }
 0x594   :  { %2389 = vmatpush3.msra.mxu1 %v2986_v38  ;;  %2362 = vmatpush3.msra.mxu0 %v3010_v43 }
 0x595   :  { %2390 = vmatprep.subr.mxu1 %v2573_v1  ;;  %2363 = vmatprep.subr.mxu0 %v2573_v1 }
 0x596   :  { %2391 = vmatpush3.msra.mxu1 %v2992_v39  ;;  %2364 = vmatpush3.msra.mxu0 %v3016_v45 }
 0x597   :  { %2392 = vmatprep.subr.mxu1 %v2573_v1  ;;  %2365 = vmatprep.subr.mxu0 %v2573_v1 }
 0x598   :  { %2393 = vmatpush3.msra.mxu1 %v2998_v40  ;;  %2366 = vmatpush3.msra.mxu0 %v3022_v46 }
 0x599   :  { %2394 = vmatprep.subr.mxu1 %v2573_v1  ;;  %2367 = vmatprep.subr.mxu0 %v2573_v1 }
 0x59a   :  { %2395 = vmatpush3.msra.mxu1 %v3004_v41  ;;  %2368 = vmatpush3.msra.mxu0 %v3025_v0 }
 0x59b   :  { %2396 = vmatprep.subr.mxu1 %v2573_v1  ;;  %2369 = vmatprep.subr.mxu0 %v2573_v1 }
 0x59c   :  { %2397 = vmatpush3.msra.mxu1 %v3010_v43  ;;  %2370 = vmatpush3.msra.mxu0 %v3031_v47 }
 0x59d   :  { %2398 = vmatprep.subr.mxu1 %v2573_v1  ;;  %2371 = vmatprep.subr.mxu0 %v2573_v1 }
 0x59e   :  { %2399 = vmatpush3.msra.mxu1 %v3016_v45  ;;  %2372 = vmatpush3.msra.mxu0 %v3037_v48 }
 0x59f   :  { %2400 = vmatprep.subr.mxu1 %v2573_v1  ;;  %2408 = vmatprep.mubr.msk.f32.mxu1 %vm2574_vm0, %v2573_v1 }
 0x5a0   :  { %2401 = vmatpush3.msra.mxu1 %v3022_v46 }
 0x5a1   :  { %2402 = vmatprep.subr.mxu1 %v2573_v1 }
 0x5a2   :  { %2403 = vmatpush3.msra.mxu1 %v3025_v0 }
 0x5a3   :  { %2404 = vmatprep.subr.mxu1 %v2573_v1 }
 0x5a4   :  { %2405 = vmatpush3.msra.mxu1 %v3031_v47 }
 0x5a5   :  { %2406 = vmatprep.subr.mxu1 %v2573_v1 }
 0x5a6   :  { %2407 = vmatpush3.msra.mxu1 %v3037_v48 }
 0x63f   :  { %v2120_v32 = vpop.f32.mrf.mxu0 }
 0x641   :  { %v2121_v33 = vpop.f32.mrf.mxu0 }
 0x642   :  { %v2122_v35 = vadd.f32 %v2121_v33, %v2120_v32 }
 0x643   :  { %v2123_v34 = vpop.f32.mrf.mxu0 }
 0x644   :  { %v1622_v40 = vadd.f32 %v2122_v35, %v1941_v37 }
 0x645   :  { %v2124_v36 = vpop.f32.mrf.mxu0 }
 0x646   :  { %v2125_v38 = vadd.f32 %v2124_v36, %v2123_v34 }
 0x647   :  { %v1662_v39 = vpop.f32.mrf.mxu1 }
 0x648   :  { %v1663_v43 = vadd.f32 %v1662_v39, %v1622_v40  ;;  %v1625_v45 = vadd.f32 %v2125_v38, %v1941_v37 }
 0x649   :  { %v2339_v41 = vpop.f32.mrf.mxu1 }
 0x64a   :  { %v1678_v47 = vmul.f32 %v1663_v43, %v1663_v43 }
 0x64b   :  { %v1665_v46 = vpop.f32.mrf.mxu1 }
 0x64c   :  { %v1666_v0 = vadd.f32 %v1665_v46, %v1625_v45 }
 0x64d   :  { %v2340_v1 = vpop.f32.mrf.mxu1 }
 0x64e   :  { %v1671_v48 = vadd.f32 %v1666_v0, %v1663_v43  ;;  %v1679_v61 = vmul.f32 %v1666_v0, %v1666_v0 }
 0x650   :  { %v1672_v62 = vrot.slane %v1671_v48, 4  ;;  %v1680_v63 = vadd.f32 %v1679_v61, %v1678_v47 }
 0x652   :  { %v1673_v2 = vadd.f32 %v1672_v62, %v1671_v48  ;;  %v1681_v3 = vrot.slane %v1680_v63, 4 }
 0x654   :  { %v1674_v4 = vrot.slane %v1673_v2, 2  ;;  %v1682_v5 = vadd.f32 %v1681_v3, %v1680_v63 }
 0x656   :  { %v1675_v6 = vadd.f32 %v1674_v4, %v1673_v2  ;;  %v1683_v7 = vrot.slane %v1682_v5, 2 }
 0x658   :  { %v1676_v8 = vrot.slane %v1675_v6, 1  ;;  %v1684_v10 = vadd.f32 %v1683_v7, %v1682_v5 }
 0x65a   :  { %v1677_v12 = vadd.f32 %v1676_v8, %v1675_v6  ;;  %v1685_v13 = vrot.slane %v1684_v10, 1 }
 0x65c   :  { %2374 = vmatmul.mubr.f32.vlgmr.msra.gmra.mxu0 %v1677_v12  ;;  %v1686_v14 = vadd.f32 %v1685_v13, %v1684_v10 }
 0x65e   :  { %2409 = vmatmul.mubr.f32.vlgmr.msra.gmra.mxu1 %v1686_v14 }
 0x71c   :  { %v1753_v15 = vpop.f32.mrf.mxu0 }
 0x71d   :  { %v1757_v16 = vmul.f32 0.001953125, %v1753_v15 }
 0x71e   :  { %v2375_v17 = vpop.f32.mrf.mxu0  ;;  %v1824_v9 = vpop.f32.mrf.mxu1 }
 0x71f   :  { %v1829_v11 = vmul.f32 %v1757_v16, %v1757_v16  ;;  %v1828_v42 = vmul.f32 0.001953125, %v1824_v9 }
 0x720   :  { %v2410_v18 = vpop.f32.mrf.mxu1 }
 0x721   :  { %v1830_v19 = vsub.f32 %v1828_v42, %v1829_v11 }
 0x723   :  { %v1831_v44 = vmax.f32 %v1830_v19, 0.0 }
 0x725   :  { %v1832_v20 = vadd.f32 1e-05, %v1831_v44 }
 0x727   :  { %2522 = vrsqrt.f32 %v1832_v20 }
 0x734   :  { %v2523_v22 = vpop.eup %2522 }
 0x735   :  { %v1834_v23 = vmul.f32 %v2523_v22, %v1669_v21 }
 0x737   :  { %v1835_v26 = vmul.f32 %v1834_v23, %v1757_v16  ;;  %v1841_v27 = vrot.slane %v1834_v23, %v2806_v24 }
 0x739   :  { %v1836_v28 = vsub.f32 %v1670_v25, %v1835_v26  ;;  %v1843_v29 = vmul.f32 %v1841_v27, %v1663_v43  ;;  %v1844_v30 = vmul.f32 %v1841_v27, %v1666_v0 }
 0x73b   :  { %v1849_v31 = vrot.slane %v1836_v28, %v2806_v24 }
 0x73d   :  { %v1851_v49 = vadd.f32 %v1849_v31, %v1843_v29  ;;  %v1852_v50 = vadd.f32 %v1849_v31, %v1844_v30 }
 0x73f   :  { %vm1853_vm8 = vcmp.ge.f32.partialorder %v1851_v49, 0.0  ;;  %vm1854_vm9 = vcmp.ge.f32.partialorder %v1852_v50, 0.0  ;;  %v1855_v51 = vmul.f32 0.01, %v1851_v49  ;;  %v1856_v52 = vmul.f32 0.01, %v1852_v50 }
 0x741   :  { %v1857_v53 = vsel %vm1853_vm8, %v1851_v49, %v1855_v51  ;;  %v1858_v54 = vsel %vm1854_vm9, %v1852_v50, %v1856_v52 }
 0x742   :  { %1859 = vst [vmem:[%s3251_s18] sm:$0xff] %v1857_v53  ;;  %1860 = vst [vmem:[%s3251_s18 + $0x8] sm:$0xff] %v1858_v54 }
 0x743   :  { %1865 = vsyncpa [#allocation3], 1 }
 0x744   :  { %1866 = vsyncpa [#allocation5], 1 }

</bundles_post_ra>
